<compile_context>
chip_gen: v7x
topology: tpu7x:2x2x1
jax: 0.10.0
libtpu: 0.0.40
codegen_flags: <defaults>
</compile_context>

<pallas_src>
import functools

import jax
import jax.numpy as jnp
from jax.experimental import pallas as pl
from jax.experimental.pallas import tpu as pltpu


# --------------------------------------------------------------------------
# Stage 1: per-batch Linear + similarity graph + graph @ h (+ BN partial sums)
# --------------------------------------------------------------------------
def _stage1_kernel(x_ref, wt_ref, hp_ref, s_ref, ss_ref, *, mm_dtype):
    x = x_ref[...]                                   # (1, V, C)  float32
    wt = wt_ref[...]                                 # (C, C)     float32 (Cin, Cout)

    # Linear: h = x @ W^T (weight already transposed in the wrapper).
    h = jnp.einsum("nvc,co->nvo",
                   x.astype(mm_dtype), wt.astype(mm_dtype),
                   preferred_element_type=jnp.float32)          # (1, V, C)

    # Pairwise L2 distances, kept in f32 to avoid cancellation error.
    sq = jnp.sum(x * x, axis=2)                                 # (1, V)
    gram = jnp.einsum("nvc,nuc->nvu", x, x,
                      preferred_element_type=jnp.float32)       # (1, V, V)
    dist2 = sq[:, None, :] + sq[:, :, None] - 2.0 * gram
    dist = jnp.sqrt(jnp.maximum(dist2, 1e-12))

    # sim = 2 / (exp(d) + 1) == 1 - tanh(d / 2): single EUP op, no divide,
    # and sim is provably in (0, 1] so no abs() is needed for the L1 norm.
    sim = 1.0 - jnp.tanh(0.5 * dist)                            # (1, V, V)

    # F.normalize(sim, p=1, dim=2): fold the row normalization into the
    # matmul result (V*C multiplies) instead of dividing the (V, V) tensor.
    row_l1 = jnp.sum(sim, axis=2, keepdims=True)                # (1, V, 1)
    inv_row = 1.0 / jnp.maximum(row_l1, 1e-12)

    hp = jnp.einsum("nvu,nuo->nvo",
                    sim.astype(mm_dtype), h.astype(mm_dtype),
                    preferred_element_type=jnp.float32)         # (1, V, C)
    hp = hp * inv_row

    hp_ref[...] = hp
    # Per-batch partial sums for the global BatchNorm statistics.
    s_ref[...] = jnp.sum(hp, axis=1, keepdims=True)             # (1, 1, C)
    ss_ref[...] = jnp.sum(hp * hp, axis=1, keepdims=True)       # (1, 1, C)


# --------------------------------------------------------------------------
# Stage 2: lane-dense BatchNorm affine + LeakyReLU + residual epilogue
# --------------------------------------------------------------------------
def _epilogue_kernel(x_ref, hp_ref, a_ref, b_ref, o_ref, *, gamma, slope):
    y = hp_ref[...] * a_ref[...] + b_ref[...]        # (hp - mean) * inv_std
    y = jnp.where(y > 0, y, slope * y)               # LeakyReLU(0.1)
    o_ref[...] = (1.0 - gamma) * x_ref[...] + gamma * y


def _vmem_limit(step_bytes):
    # Generous headroom for double-buffering + temporaries, but stay well
    # under the smallest physical VMEM (v7x: 64 MiB per TensorCore).
    want = int(step_bytes * 4)
    return max(16 * 1024 * 1024, min(want, 52 * 1024 * 1024))


def _pick_row_tile(rows):
    for t in (1024, 512, 256, 128, 64, 32, 16, 8):
        if rows % t == 0:
            return t
    return rows  # single full-extent block (allowed: equals full array dim)


def graph_layer_forward(x, w, gamma=0.1, bn_eps=1e-5, slope=0.1,
                        matmul_dtype=jnp.float32):
    """x: (N, V, C) float32; w: (C, C) float32 (PyTorch Linear weight layout).

    matmul_dtype=jnp.bfloat16 halves MXU operand bytes on v6e/v7x; kept f32
    by default for strict numerical parity with the f32 PyTorch module.
    """
    N, V, C = x.shape
    assert w.shape == (C, C), "residual connection requires in == out features"
    w_t = jnp.transpose(w)                            # (Cin, Cout), outside kernel

    # ---- stage 1: per-batch heavy pass (grid over N, parallel) ----
    itemsize = 4
    step_bytes = itemsize * (4 * V * C + 2 * C * C + 5 * V * V + 8 * C)
    flops1 = N * (2 * V * C * C + 4 * V * V * C + 16 * V * V)

    hp, bsum, bsumsq = pl.pallas_call(
        functools.partial(_stage1_kernel, mm_dtype=matmul_dtype),
        out_shape=(
            jax.ShapeDtypeStruct((N, V, C), jnp.float32),
            jax.ShapeDtypeStruct((N, 1, C), jnp.float32),
            jax.ShapeDtypeStruct((N, 1, C), jnp.float32),
        ),
        grid_spec=pltpu.PrefetchScalarGridSpec(
            num_scalar_prefetch=0,
            grid=(N,),
            in_specs=[
                pl.BlockSpec((1, V, C), lambda n: (n, 0, 0)),
                pl.BlockSpec((C, C), lambda n: (0, 0)),
            ],
            out_specs=(
                pl.BlockSpec((1, V, C), lambda n: (n, 0, 0)),
                pl.BlockSpec((1, 1, C), lambda n: (n, 0, 0)),
                pl.BlockSpec((1, 1, C), lambda n: (n, 0, 0)),
            ),
        ),
        compiler_params=pltpu.CompilerParams(
            dimension_semantics=("parallel",),
            vmem_limit_bytes=_vmem_limit(step_bytes),
        ),
        cost_estimate=pl.CostEstimate(
            flops=flops1,
            transcendentals=N * V * V,
            bytes_accessed=itemsize * (2 * N * V * C + C * C + 2 * N * C),
        ),
    )(x, w_t)

    # ---- BatchNorm statistics over the flattened (N*V) dim (tiny XLA reduce) ----
    cnt = float(N * V)
    mean = jnp.sum(bsum, axis=(0, 1)) / cnt                           # (C,)
    var = jnp.maximum(jnp.sum(bsumsq, axis=(0, 1)) / cnt - mean * mean, 0.0)
    inv_std = jax.lax.rsqrt(var + bn_eps)
    a = inv_std                                                       # BN scale
    b = -mean * inv_std                                               # BN shift
    # TODO(synk): BatchNorm1d running_mean/running_var buffer updates (a
    # training-mode side effect) are not reproduced; only the forward output is.

    # ---- stage 2: lane-dense epilogue (BN affine + LeakyReLU + residual) ----
    total = N * V * C
    if total % 128 == 0 and 128 % C == 0:
        lanes = 128                                   # fully lane-dense stores
        a_row = jnp.tile(a, lanes // C).reshape(1, lanes)
        b_row = jnp.tile(b, lanes // C).reshape(1, lanes)
    else:
        lanes = C                                     # fallback: channel-last 2D
        a_row = a.reshape(1, lanes)
        b_row = b.reshape(1, lanes)
    rows = total // lanes
    x2 = x.reshape(rows, lanes)
    hp2 = hp.reshape(rows, lanes)
    tile_r = _pick_row_tile(rows)

    out2 = pl.pallas_call(
        functools.partial(_epilogue_kernel, gamma=gamma, slope=slope),
        out_shape=jax.ShapeDtypeStruct((rows, lanes), x.dtype),
        grid_spec=pltpu.PrefetchScalarGridSpec(
            num_scalar_prefetch=0,
            grid=(rows // tile_r,),
            in_specs=[
                pl.BlockSpec((tile_r, lanes), lambda r: (r, 0)),
                pl.BlockSpec((tile_r, lanes), lambda r: (r, 0)),
                pl.BlockSpec((1, lanes), lambda r: (0, 0)),
                pl.BlockSpec((1, lanes), lambda r: (0, 0)),
            ],
            out_specs=pl.BlockSpec((tile_r, lanes), lambda r: (r, 0)),
        ),
        compiler_params=pltpu.CompilerParams(
            dimension_semantics=("parallel",),
            vmem_limit_bytes=_vmem_limit(itemsize * (3 * tile_r * lanes + 2 * lanes)),
        ),
        cost_estimate=pl.CostEstimate(
            flops=6 * total,
            transcendentals=0,
            bytes_accessed=itemsize * (3 * total + 2 * lanes),
        ),
    )(x2, hp2, a_row, b_row)

    return out2.reshape(N, V, C)


# --------------------------------------------------------------------------
# Pure-JAX reference (mirrors the PyTorch module literally) for checking.
# --------------------------------------------------------------------------
def graph_layer_reference(x, w, gamma=0.1, bn_eps=1e-5, slope=0.1):
    h = jnp.einsum("nvc,oc->nvo", x, w)
    sq = jnp.sum(x * x, axis=2)
    gram = jnp.einsum("nvc,nuc->nvu", x, x)
    dist = jnp.sqrt(jnp.maximum(sq[:, None, :] + sq[:, :, None] - 2.0 * gram, 1e-12))
    sim = 2.0 / (jnp.exp(dist) + 1.0)
    graph = sim / jnp.maximum(jnp.sum(jnp.abs(sim), axis=2, keepdims=True), 1e-12)
    hp = jnp.einsum("nvu,nuo->nvo", graph, h)
    mean = jnp.mean(hp, axis=(0, 1), keepdims=True)
    var = jnp.mean((hp - mean) ** 2, axis=(0, 1), keepdims=True)
    hp = (hp - mean) * jax.lax.rsqrt(var + bn_eps)
    hp = jnp.where(hp > 0, hp, slope * hp)
    return (1.0 - gamma) * x + gamma * hp


if __name__ == "__main__":
    # Small shapes: batch=2, num_vertex=16, in_features=out_features=32
    # (the residual connection in the PyTorch module requires in == out).
    N, V, C = 2, 16, 32
    gamma = 0.1

    key = jax.random.PRNGKey(0)
    k_x, k_w = jax.random.split(key)
    x = jax.random.normal(k_x, (N, V, C), dtype=jnp.float32)
    # nn.Linear weight init in _init_params: Normal(0, 0.01); no bias.
    w = 0.01 * jax.random.normal(k_w, (C, C), dtype=jnp.float32)
    # BatchNorm1d params: weight=1, bias=0 -> no-ops, folded into the kernel.

    out = graph_layer_forward(x, w, gamma=gamma)
    out = jax.block_until_ready(out)

    ref = graph_layer_reference(x, w, gamma=gamma)
    assert out.shape == (N, V, C)
    assert jnp.allclose(out, ref, atol=1e-4, rtol=1e-4), "mismatch vs. JAX reference"

    print("KERNEL_OK")
</pallas_src>

<mosaic_0001>
module attributes {stable_mosaic.version = 11 : i64} {
  func.func @_stage1_kernel(%arg0: i32, %arg1: memref<1x16x32xf32, #tpu.memory_space<vmem>>, %arg2: memref<32x32xf32, #tpu.memory_space<vmem>>, %arg3: memref<1x16x32xf32, #tpu.memory_space<vmem>>, %arg4: memref<1x1x32xf32, #tpu.memory_space<vmem>>, %arg5: memref<1x1x32xf32, #tpu.memory_space<vmem>>) attributes {dimension_semantics = [#tpu.dimension_semantics<parallel>], iteration_bounds = array<i64: 2>, scalar_prefetch = 0 : i64, scratch_operands = 0 : i64, tpu.core_type = #tpu.core_type<tc>, window_params = [{transform_indices = @transform_0, window_bounds = array<i64: 1, 16, 32>}, {pipeline_mode = #tpu.pipeline_mode<synchronous>, transform_indices = @transform_1, window_bounds = array<i64: 32, 32>}, {transform_indices = @transform_2, window_bounds = array<i64: 1, 16, 32>}, {transform_indices = @transform_3, window_bounds = array<i64: 1, 1, 32>}, {transform_indices = @transform_4, window_bounds = array<i64: 1, 1, 32>}]} {
    %c0 = arith.constant 0 : index
    %c0_0 = arith.constant 0 : index
    %c0_1 = arith.constant 0 : index
    %0 = vector.load %arg1[%c0, %c0_0, %c0_1] : memref<1x16x32xf32, #tpu.memory_space<vmem>>, vector<1x16x32xf32>
    %c0_2 = arith.constant 0 : index
    %c0_3 = arith.constant 0 : index
    %1 = vector.load %arg2[%c0_2, %c0_3] : memref<32x32xf32, #tpu.memory_space<vmem>>, vector<32x32xf32>
    "tpu.trace_start"() <{level = 10 : i32, message = "nvc,co->nvo"}> : () -> ()
    %cst = arith.constant dense<0.000000e+00> : vector<1x16x32xf32>
    %2 = tpu.matmul %0, %1, %cst {dimension_numbers = #tpu.dot_dimension_numbers<[2], [0], [0, 1], [1], [0, 0, 0, 1, 1, 1], [], []>} : vector<1x16x32xf32>, vector<32x32xf32>, vector<1x16x32xf32> -> vector<1x16x32xf32>
    "tpu.trace_stop"() : () -> ()
    %3 = arith.mulf %0, %0 : vector<1x16x32xf32>
    %cst_4 = arith.constant dense<0.000000e+00> : vector<1x16xf32>
    %4 = vector.multi_reduction <add>, %3, %cst_4 [2] : vector<1x16x32xf32> to vector<1x16xf32>
    "tpu.trace_start"() <{level = 10 : i32, message = "nvc,nuc->nvu"}> : () -> ()
    %cst_5 = arith.constant dense<0.000000e+00> : vector<1x16x16xf32>
    %5 = tpu.matmul %0, %0, %cst_5 {dimension_numbers = #tpu.dot_dimension_numbers<[2], [2], [1], [1], [0, 0, 0, 1, 1, 1], [0], [0]>} : vector<1x16x32xf32>, vector<1x16x32xf32>, vector<1x16x16xf32> -> vector<1x16x16xf32>
    "tpu.trace_stop"() : () -> ()
    %6 = vector.shape_cast %4 : vector<1x16xf32> to vector<1x1x16xf32>
    %7 = vector.shape_cast %4 : vector<1x16xf32> to vector<1x16x1xf32>
    %8 = vector.broadcast %6 : vector<1x1x16xf32> to vector<1x16x16xf32>
    %9 = vector.broadcast %7 : vector<1x16x1xf32> to vector<1x16x16xf32>
    %10 = arith.addf %8, %9 : vector<1x16x16xf32>
    %cst_6 = arith.constant 2.000000e+00 : f32
    %11 = vector.broadcast %cst_6 : f32 to vector<1x16x16xf32>
    %12 = arith.mulf %11, %5 : vector<1x16x16xf32>
    %13 = arith.subf %10, %12 : vector<1x16x16xf32>
    %cst_7 = arith.constant 9.99999996E-13 : f32
    %14 = vector.broadcast %cst_7 : f32 to vector<1x16x16xf32>
    %15 = arith.maximumf %13, %14 : vector<1x16x16xf32>
    %16 = math.sqrt %15 : vector<1x16x16xf32>
    %cst_8 = arith.constant 5.000000e-01 : f32
    %17 = vector.broadcast %cst_8 : f32 to vector<1x16x16xf32>
    %18 = arith.mulf %17, %16 : vector<1x16x16xf32>
    %19 = math.tanh %18 : vector<1x16x16xf32>
    %cst_9 = arith.constant 1.000000e+00 : f32
    %20 = vector.broadcast %cst_9 : f32 to vector<1x16x16xf32>
    %21 = arith.subf %20, %19 : vector<1x16x16xf32>
    %cst_10 = arith.constant dense<0.000000e+00> : vector<1x16xf32>
    %22 = vector.multi_reduction <add>, %21, %cst_10 [2] : vector<1x16x16xf32> to vector<1x16xf32>
    %23 = vector.shape_cast %22 : vector<1x16xf32> to vector<1x16x1xf32>
    %cst_11 = arith.constant 9.99999996E-13 : f32
    %24 = vector.broadcast %cst_11 : f32 to vector<1x16x1xf32>
    %25 = arith.maximumf %23, %24 : vector<1x16x1xf32>
    %cst_12 = arith.constant 1.000000e+00 : f32
    %26 = vector.broadcast %cst_12 : f32 to vector<1x16x1xf32>
    %27 = arith.divf %26, %25 : vector<1x16x1xf32>
    "tpu.trace_start"() <{level = 10 : i32, message = "nvu,nuo->nvo"}> : () -> ()
    %cst_13 = arith.constant dense<0.000000e+00> : vector<1x16x32xf32>
    %28 = tpu.matmul %21, %2, %cst_13 {dimension_numbers = #tpu.dot_dimension_numbers<[2], [1], [1], [2], [0, 0, 0, 1, 1, 2], [0], [0]>} : vector<1x16x16xf32>, vector<1x16x32xf32>, vector<1x16x32xf32> -> vector<1x16x32xf32>
    "tpu.trace_stop"() : () -> ()
    %29 = vector.broadcast %27 : vector<1x16x1xf32> to vector<1x16x32xf32>
    %30 = arith.mulf %28, %29 : vector<1x16x32xf32>
    %c0_14 = arith.constant 0 : index
    %c0_15 = arith.constant 0 : index
    %c0_16 = arith.constant 0 : index
    %31 = vector.load %arg3[%c0_14, %c0_15, %c0_16] : memref<1x16x32xf32, #tpu.memory_space<vmem>>, vector<1x16x32xf32>
    tpu.vector_store %arg3[%c0_14, %c0_15, %c0_16], %30 {strides = array<i32>} : memref<1x16x32xf32, #tpu.memory_space<vmem>>, vector<1x16x32xf32>,
    %cst_17 = arith.constant dense<0.000000e+00> : vector<1x32xf32>
    %32 = vector.multi_reduction <add>, %30, %cst_17 [1] : vector<1x16x32xf32> to vector<1x32xf32>
    %33 = vector.shape_cast %32 : vector<1x32xf32> to vector<1x1x32xf32>
    %c0_18 = arith.constant 0 : index
    %c0_19 = arith.constant 0 : index
    %c0_20 = arith.constant 0 : index
    %34 = vector.load %arg4[%c0_18, %c0_19, %c0_20] : memref<1x1x32xf32, #tpu.memory_space<vmem>>, vector<1x1x32xf32>
    tpu.vector_store %arg4[%c0_18, %c0_19, %c0_20], %33 {strides = array<i32>} : memref<1x1x32xf32, #tpu.memory_space<vmem>>, vector<1x1x32xf32>,
    %35 = arith.mulf %30, %30 : vector<1x16x32xf32>
    %cst_21 = arith.constant dense<0.000000e+00> : vector<1x32xf32>
    %36 = vector.multi_reduction <add>, %35, %cst_21 [1] : vector<1x16x32xf32> to vector<1x32xf32>
    %37 = vector.shape_cast %36 : vector<1x32xf32> to vector<1x1x32xf32>
    %c0_22 = arith.constant 0 : index
    %c0_23 = arith.constant 0 : index
    %c0_24 = arith.constant 0 : index
    %38 = vector.load %arg5[%c0_22, %c0_23, %c0_24] : memref<1x1x32xf32, #tpu.memory_space<vmem>>, vector<1x1x32xf32>
    tpu.vector_store %arg5[%c0_22, %c0_23, %c0_24], %37 {strides = array<i32>} : memref<1x1x32xf32, #tpu.memory_space<vmem>>, vector<1x1x32xf32>,
    return
  }
  func.func @transform_0(%arg0: i32) -> (i32, i32, i32) {
    %c0_i32 = arith.constant 0 : i32
    %c0_i32_0 = arith.constant 0 : i32
    %c0_i32_1 = arith.constant 0 : i32
    return %arg0, %c0_i32, %c0_i32_0 : i32, i32, i32
  }
  func.func @transform_1(%arg0: i32) -> (i32, i32) {
    %c0_i32 = arith.constant 0 : i32
    %c0_i32_0 = arith.constant 0 : i32
    %c0_i32_1 = arith.constant 0 : i32
    return %c0_i32, %c0_i32_0 : i32, i32
  }
  func.func @transform_2(%arg0: i32) -> (i32, i32, i32) {
    %c0_i32 = arith.constant 0 : i32
    %c0_i32_0 = arith.constant 0 : i32
    %c0_i32_1 = arith.constant 0 : i32
    return %arg0, %c0_i32, %c0_i32_0 : i32, i32, i32
  }
  func.func @transform_3(%arg0: i32) -> (i32, i32, i32) {
    %c0_i32 = arith.constant 0 : i32
    %c0_i32_0 = arith.constant 0 : i32
    %c0_i32_1 = arith.constant 0 : i32
    return %arg0, %c0_i32, %c0_i32_0 : i32, i32, i32
  }
  func.func @transform_4(%arg0: i32) -> (i32, i32, i32) {
    %c0_i32 = arith.constant 0 : i32
    %c0_i32_0 = arith.constant 0 : i32
    %c0_i32_1 = arith.constant 0 : i32
    return %arg0, %c0_i32, %c0_i32_0 : i32, i32, i32
  }
}

</mosaic_0001>

<bundles_post_ra>
// kernel: tpu_custom_call.1
= control target key start
LH: loop header
LB: loop body
LE: loop exit
PB: predicated region body
PF: predicated region fallthrough
CT: control target
= control target key end

     0   :  { %10 = vsyncpa [#allocation3], 0  ;;  %s3123_s0 = inlined_call_operand.hbm [shape: f32[2,16,32], index: 0, kind: input, shape index: {}]   ;;  %s3124_s1 = inlined_call_operand.hbm [shape: f32[32,32], index: 1, kind: input, shape index: {}]   ;;  %s3125_s2 = inlined_call_operand.hbm [shape: f32[2,16,32], index: 2, kind: output, shape index: {0}]   ;;  %s3126_s3 = inlined_call_operand.hbm [shape: f32[2,1,32], index: 3, kind: output, shape index: {1}]   ;;  %s3127_s4 = inlined_call_operand.hbm [shape: f32[2,1,32], index: 4, kind: output, shape index: {2}]  }
   0x1   :  { %12 = vsyncpa [#allocation3 + $0x1], 0 }
   0x2   :  { %13 = vsyncpa [#allocation6], 0 }
   0x3   :  { %14 = vsyncpa [#allocation4], 0 }
   0x4   :  { %16 = vsyncpa [#allocation4 + $0x1], 0 }
   0x5   :  { %17 = vsyncpa [#allocation9], 0 }
   0x6   :  { %19 = vsyncpa [#allocation9 + $0x1], 0  ;;  %s2246_s15 = smov 0   ;;  %s2248_s16 = smov 0  }
   0x7   :  { %s2250_s17 = smov 0   ;;  %s2252_s18 = smov 0  }
   0x8 LB: > { %s2267_s19 = sadd.s32 4294967295, %s2209_s18   ;;  %s1730_s20 = sadd.s32 4294967294, %s2209_s18   ;;  %s2209_s18 = sphi %s2252_s18, %s3147_s18   ;;  %s2205_s17 = sphi %s2250_s17, %s3146_s17   ;;  %s2201_s16 = sphi %s2248_s16, %s3145_s16   ;;  %s2197_s15 = sphi %s2246_s15, %s3144_s15  }
   0x9   : > { %p45_p0 = scmp.ne.s32.totalorder %s2201_s16, %s2197_s15  ;;  %p3128_p1 = scmp.eq.s32.totalorder %s2267_s19, 0 }
   0xa   : > { %p96_p3 = scmp.eq.s32.totalorder %s1730_s20, 1  ;;  %p1731_p5 = scmp.ge.s32.totalorder %s2209_s18, 1 }
   0xb   : > { %p2278_p4 = por %p3128_p1, %p45_p0  ;;  %p155_p7 = scmp.lt.s32.totalorder %s2209_s18, 3 }
   0xc   : > { %p2283_p6 = por %p96_p3, %p45_p0  ;;  %s2211_s24 = smov [#allocation5]  }
   0xd   : > { %s3131_s21 = scalar_select %p2278_p4, 1, 0 }
   0xe   : > { %s3132_s22 = scalar_select %p2283_p6, 1, 0 }
   0xf   : > { %p2288_p8 = pnand %p1731_p5, %p155_p7  ;;  %s167_s25 = sshll.u32 %s2211_s24, 4  ;;  %s2292_s25 = int_to_ptr.vmem [resolvable:$true] %s167_s25 }
  0x10   : > { %s2304_s27 = sadd.s32 1, %s2209_s18   ;;  %s32_s28 = sadd.s32 1, %s2205_s17 }
  0x11   : > { %s3133_s23 = scalar_select %p2288_p8, 1, 0 }
  0x12   : > { %p1827_p9 = pneg %p2288_p8  ;;  %s29_s29 = ssub.s32 %s2209_s18, %s2304_s27 }
  0x13   : > { %s2021_s6 = scalar_lea.hbm %s3124_s1, 512 }
  0x14   : > { %p2299_p11 = pnand %p1827_p9, %p3128_p1  ;;  %p2022_p12 = scmp.ne.s32.totalorder %s3124_s1, %s2021_s6 }
  0x15   : > { %p2028_p5 = scmp.lt.u32.totalorder %s2021_s6, %s3124_s1 }
  0x16   : > { %p2023_p13 = pneg %p2299_p11 }
  0x18   : > { %p2024_p0 = pnand %p2023_p13, %p2022_p12 }
  0x1a   : > { %p2025_p3 = pneg %p2024_p0 }
  0x1c   : > { %p2030_p7 = pnand %p2028_p5, %p2025_p3 }
  0x1e   : > { %2033 = shalt.err (!%p2030_p7)
}
  0x1f   : > { %s2034_s11 = scalar_lea.vmem %s2292_s25, 512  ;;  %p2042_p2 = scmp.lt.s32.totalorder %s2292_s25, %s2292_s25 }
  0x20   : > { %p2035_p9 = scmp.ne.s32.totalorder %s2292_s25, %s2034_s11  ;;  %p2043_p6 = scmp.lt.s32.totalorder %s2034_s11, %s2034_s11 }
  0x22   : > { %p2037_p10 = pnand %p2035_p9, %p2023_p13  ;;  %p2044_p4 = por %p2043_p6, %p2042_p2 }
  0x24   : > { %p2038_p1 = pneg %p2037_p10 }
  0x26   : > { %p2045_p8 = pnand %p2044_p4, %p2038_p1 }
  0x28   : > { %2048 = shalt.err (!%p2045_p8)
}
  0x29   : > { %s2212_s12 = smov 128   ;;  %s2213_s13 = smov 8  }
  0x2a   : > { %1830 = dma.hbm_to_vmem [thread:$0]  (!%p2299_p11), %s3124_s1, 512, %s2292_s25, [#allocation6], %s2212_s12, %s2212_s12, %s2213_s13  }
  0x2b   : > { %p30_p1 = scmp.eq.s32.totalorder %s29_s29, 0  ;;  %p39_p2 = scmp.ne.s32.totalorder %s2205_s17, %s2201_s16 }
  0x2c   : > { %p40_p4 = scmp.eq.s32.totalorder %s2209_s18, 0  ;;  %p1846_p6 = scmp.lt.s32.totalorder %s2209_s18, 2 }
  0x2d   : > { %s2338_s30 = scalar_select %p30_p1, %s2205_s17, %s32_s28  }
  0x2e   : > { %p41_p8 = por %p40_p4, %p39_p2  ;;  %p3135_p10 = scmp.eq.s32.totalorder %s2267_s19, 1 }
  0x2f   : > { %s181_s26 = sand.u32 1, %s2205_s17   ;;  %s1756_s6 = sshll.u32 %s2209_s18, 8 }
  0x30   : > { %p2342_p12 = por %p3135_p10, %p39_p2  ;;  %s1734_s7 = sshll.u32 %s181_s26, 4 }
  0x31   : > { %s2351_s10 = scalar_lea.hbm %s3123_s0, %s1756_s6  ;;  %s185_s25 = scalar_lea.vmem [#allocation2], %s1734_s7 }
  0x32   : > { %s192_s28 = sshll.u32 %s185_s25, 4  ;;  %p2353_p11 = pnand %p1846_p6, %p41_p8  ;;  %s2357_s28 = int_to_ptr.vmem [resolvable:$true] %s192_s28 }
  0x33   : > { %s2359_s11 = scalar_lea.sflag [#allocation3], %s181_s26  ;;  %s2049_s14 = scalar_lea.hbm %s2351_s10, 256 }
  0x34   : > { %p2050_p13 = scmp.ne.s32.totalorder %s2351_s10, %s2049_s14  ;;  %p2051_p0 = pneg %p2353_p11 }
  0x35   : > { %s2054_s7 = scalar_lea.hbm %s3123_s0, 512  ;;  %p2055_p7 = scmp.lt.u32.totalorder %s2351_s10, %s3123_s0 }
  0x36   : > { %p2052_p3 = pnand %p2051_p0, %p2050_p13  ;;  %p2056_p9 = scmp.lt.u32.totalorder %s2054_s7, %s2049_s14 }
  0x37   : > { %p2058_p2 = scmp.lt.u32.totalorder %s2049_s14, %s2351_s10 }
  0x38   : > { %p2053_p5 = pneg %p2052_p3  ;;  %p2057_p1 = por %p2056_p9, %p2055_p7 }
  0x3a   : > { %p2059_p4 = por %p2058_p2, %p2057_p1 }
  0x3c   : > { %p2060_p6 = pnand %p2059_p4, %p2053_p5 }
  0x3e   : > { %2063 = shalt.err (!%p2060_p6)
}
  0x3f   : > { %s2064_s26 = scalar_lea.vmem %s2357_s28, 256  ;;  %s2214_s25 = smov [#allocation2]  }
  0x40   : > { %p2065_p8 = scmp.ne.s32.totalorder %s2357_s28, %s2064_s26  ;;  %s2069_s24 = sshll.u32 %s2214_s25, 4  ;;  %s2070_s24 = int_to_ptr.vmem [resolvable:$false] %s2069_s24 }
  0x41   : > { %s2071_s6 = scalar_lea.vmem %s2070_s24, 512  ;;  %p2072_p3 = scmp.lt.s32.totalorder %s2357_s28, %s2070_s24 }
  0x42   : > { %p2067_p10 = pnand %p2065_p8, %p2051_p0  ;;  %p2073_p7 = scmp.lt.s32.totalorder %s2071_s6, %s2064_s26 }
  0x44   : > { %p2068_p13 = pneg %p2067_p10  ;;  %p2074_p9 = por %p2073_p7, %p2072_p3 }
  0x46   : > { %p2075_p1 = pnand %p2074_p9, %p2068_p13 }
  0x48   : > { %2078 = shalt.err (!%p2075_p1)
}
  0x49   : > { %1834 = dma.hbm_to_vmem [thread:$0]  (!%p2353_p11), %s2351_s10, 256, %s2357_s28, %s2359_s11, %s2212_s12, %s2212_s12, %s2213_s13  }
  0x4a   : > { %p3138_p0 = scmp.ne.s32.totalorder %s3133_s23, 0 }
  0x4b   : > { %s2393_s14 = sand.u32 (!%p3138_p0), 1, %s2201_s16   ;;  %p3139_p5 = scmp.ne.s32.totalorder (!%p3138_p0), %s3131_s21, 0 }
  0x4c   : > { %204 = sbr.rel (%p3138_p0) target bundleno = 956 (0x3bc), region = 28  ;;  %s1738_s7 = sshll.u32 (!%p3138_p0), %s2393_s14, 4 }
  0x4d   : > { %s207_s8 = scalar_lea.sflag (!%p3138_p0), [#allocation3], %s2393_s14  ;;  %s210_s29 = scalar_lea.vmem (!%p3138_p0), [#allocation2], %s1738_s7 }
  0x53   : > { %2180 = dma.done.wait (%p3139_p5), %s207_s8, 256  }
  0x54   : > { %2182 = vsyncadd (%p3139_p5), %s207_s8, 4294967040  ;;  %p3140_p11 = scmp.eq.s32.totalorder %s2267_s19, 0 }
  0x56   : > { %2184 = dma.done.wait (%p3140_p11), [#allocation6], 512   ;;  %p3141_p2 = pmov %p3140_p11 }
  0x57   : > { %vm253_vm0 = vcmask 261120   ;;  %v247_v0 = vld [vmem:[%s210_s29] sm:$0xff]  ;;  %v248_v1 = vld [vmem:[%s210_s29 + $0x8] sm:$0xff]  ;;  %v420_v7 = vlaneseq  ;;  %v2215_v38 = vmov 0   ;;  %s234_s21 = scalar_lea.vmem [#allocation7], %s1738_s7  ;;  %s1757_s12 = sshll.u32 %s2267_s19, 8 }
  0x58   : > { %2186 = vsyncadd (%p3141_p2), [#allocation6], 4294966784  ;;  %v1805_v2 = vpack.c.bf16 %v248_v1, %v247_v0  ;;  %1787 = vmatprep.mubr.msk.f32.mxu1 %vm253_vm0, %v247_v0  ;;  %v335_v3 = vmul.f32 %v247_v0, %v247_v0  ;;  %v336_v4 = vmul.f32 %v248_v1, %v248_v1  ;;  %1780 = vmatprep.mubr.msk.f32.mxu0 %vm253_vm0, %v247_v0  ;;  %v249_v21 = vld [vmem:[#allocation5] sm:$0xff]  ;;  %v250_v22 = vld [vmem:[#allocation5 + $0x8] sm:$0xff]  ;;  %s1568_s23 = sshll.u32 %s234_s21, 4  ;;  %s3001_s28 = scalar_lea.hbm %s3125_s2, %s1757_s12  ;;  %s2996_s23 = int_to_ptr.vmem [resolvable:$true] %s1568_s23 }
  0x59   : > { %vm1806_vm1 = vmpackc.low %vm253_vm0, %vm253_vm0  ;;  %v2414_v8 = vshrl.u32 %v420_v7, 7  ;;  %v1257_v9 = vand.u32 127, %v420_v7  ;;  %v251_v23 = vld [vmem:[#allocation5 + $0x10] sm:$0xff]  ;;  %v252_v24 = vld [vmem:[#allocation5 + $0x18] sm:$0xff]  ;;  %v1797_v27 = vpack.c.bf16 %v250_v22, %v249_v21  ;;  %1887 = vset.pattern.permute.xlu0 %v2215_v38  ;;  %1888 = vset.pattern.permute.xlu1 %v2215_v38  ;;  %s1547_s11 = scalar_lea.sflag [#allocation4], %s2393_s14  ;;  %s2079_s9 = scalar_lea.vmem %s2996_s23, 256 }
  0x5a   : > { %1807 = vmatprep.subr.msk.bf16.mxu1 %vm1806_vm1, %v1805_v2  ;;  %v337_v5 = vsel %vm253_vm0, %v335_v3, 0.0  ;;  %v340_v6 = vsel %vm253_vm0, %v336_v4, 0.0  ;;  %v1801_v28 = vpack.c.bf16 %v252_v24, %v251_v23  ;;  %p2080_p4 = scmp.ne.s32.totalorder %s2996_s23, %s2079_s9  ;;  %s2216_s26 = smov [#allocation7]  }
  0x5b   : > { %1810 = vmatpush3.bf16.xpose.msk.msra.mxu1 %vm1806_vm1, %v1805_v2  ;;  %338 = vadd.xlane.f32.xlu0 %v337_v5  ;;  %v2417_v10 = vsub.s32 %v1257_v9, %v2414_v8  ;;  %v1262_v11 = vadd.s32 4294967288, %v1257_v9  ;;  %v2423_v13 = vsub.s32 0, %v2414_v8  ;;  %v2426_v14 = vsub.s32 1, %v2414_v8  ;;  %s2083_s25 = sshll.u32 %s2216_s26, 4  ;;  %s2084_s25 = int_to_ptr.vmem [resolvable:$false] %s2083_s25 }
  0x5c   : > { %v2431_v20 = vsub.s32 2, %v2414_v8  ;;  %v2435_v26 = vsub.s32 3, %v2414_v8  ;;  %1798 = vmatprep.subr.bf16.mxu0 %v1797_v27  ;;  %v2439_v30 = vsub.s32 4, %v2414_v8  ;;  %v2443_v32 = vsub.s32 5, %v2414_v8  ;;  %p2081_p6 = pnand %p2080_p4, %p2342_p12  ;;  %s2085_s24 = scalar_lea.vmem %s2084_s25, 512 }
  0x5d   : > { %v2420_v12 = vsub.s32 %v1262_v11, %v2414_v8  ;;  %1800 = vmatpush3.bf16.msra.mxu0 %v1797_v27  ;;  %v2448_v34 = vsub.s32 6, %v2414_v8  ;;  %v2458_v44 = vsub.s32 7, %v2414_v8  ;;  %p2086_p10 = scmp.lt.s32.totalorder %s2996_s23, %s2084_s25  ;;  %p2087_p13 = scmp.lt.s32.totalorder %s2085_s24, %s2079_s9 }
  0x5e   : > { %1802 = vmatprep.subr.bf16.mxu0 %v1801_v28  ;;  %p2082_p8 = pneg %p2081_p6 }
  0x5f   : > { %341 = vadd.xlane.f32.xlu0 %v340_v6  ;;  %p2088_p3 = por %p2087_p13, %p2086_p10 }
  0x61   : > { %1804 = vmatpush3.bf16.msra.mxu0 %v1801_v28  ;;  %p2089_p7 = pnand %p2088_p3, %p2082_p8 }
  0x62   : > { %1788 = vmatmul.mubr.msk.f32.vlgmr.msra.gmra.mrb[0].mxu1 %vm253_vm0, %v248_v1 }
  0x64   : > { %1781 = vmatmul.mubr.msk.f32.vlgmr.msra.gmra.mrb[0].mxu0 %vm253_vm0, %v248_v1 }
  0xe8   : > { %v2463_v48 = vpop.xlane.xlu0 %338 }
  0xe9   : > { %v427_v56 = vrot.slane %v2463_v48, %v2426_v14  ;;  %v435_v63 = vrot.slane %v2463_v48, %v2435_v26  ;;  %v447_v21 = vrot.slane %v2463_v48, %v2448_v34 }
  0xeb   : > { %v2502_v5 = vadd.f32 %v427_v56, %v2463_v48 }
  0xec   : > { %v2465_v49 = vpop.xlane.xlu0 %341 }
  0xed   : > { %v455_v50 = vrot.slane %v2465_v49, %v2423_v13  ;;  %v459_v51 = vrot.slane %v2465_v49, %v2426_v14  ;;  %v463_v52 = vrot.slane %v2465_v49, %v2431_v20  ;;  %v467_v53 = vrot.slane %v2465_v49, %v2435_v26 }
  0xee   : > { %v471_v54 = vrot.slane %v2465_v49, %v2439_v30  ;;  %v475_v55 = vrot.slane %v2465_v49, %v2443_v32  ;;  %v479_v59 = vrot.slane %v2465_v49, %v2448_v34  ;;  %v2509_v11 = vadd.f32 %v435_v63, %v2465_v49 }
  0xef   : > { %v516_v57 = vadd.f32 %v455_v50, %v2463_v48  ;;  %v519_v58 = vadd.f32 %v459_v51, %v2465_v49  ;;  %v518_v60 = vadd.f32 %v459_v51, %v2463_v48  ;;  %v2487_v61 = vadd.f32 %v463_v52, %v2463_v48 }
  0xf0   : > { %v2490_v62 = vadd.f32 %v467_v53, %v2463_v48  ;;  %v517_v2 = vadd.f32 %v455_v50, %v2465_v49  ;;  %v2496_v3 = vadd.f32 %v471_v54, %v2463_v48  ;;  %v2499_v4 = vadd.f32 %v475_v55, %v2463_v48 }
  0xf1   : > { %v521_v8 = vadd.f32 %v463_v52, %v2465_v49  ;;  %v2506_v9 = vadd.f32 %v479_v59, %v2463_v48  ;;  %v525_v24 = vadd.f32 %v471_v54, %v2465_v49  ;;  %v2557_v38 = vadd.f32 %v447_v21, %v2465_v49 }
  0xf2   : > { %v2587_v52 = vadd.f32 %v447_v21, %v2463_v48 }
 0x135   : > { %v1789_v15 = vpop.f32.mrb[0].mxu1 }
 0x136   : > { %v533_v16 = vmul.f32 2.0, %v1789_v15  ;;  %v409_v17 = vpop.f32.mrb[1].mxu1  ;;  %v439_v15 = vrot.slane %v2463_v48, %v2439_v30 }
 0x137   : > { %v532_v35 = vmul.f32 2.0, %v409_v17 }
 0x138   : > { %v627_v18 = vrot.slane %v533_v16, %v2423_v13  ;;  %v638_v19 = vrot.slane %v533_v16, %v2426_v14  ;;  %v649_v25 = vrot.slane %v533_v16, %v2431_v20  ;;  %v660_v29 = vrot.slane %v533_v16, %v2435_v26 }
 0x139   : > { %v671_v31 = vrot.slane %v533_v16, %v2439_v30  ;;  %v682_v33 = vrot.slane %v533_v16, %v2443_v32  ;;  %v693_v36 = vrot.slane %v533_v16, %v2448_v34  ;;  %v550_v37 = vrot.slane %v532_v35, %v2426_v14 }
 0x13a   : > { %629 = vbcast.lane.b32.xlu1 %v627_v18, 256  ;;  %644 = vbcast.lane.b32.xlu0 %v638_v19, 264  ;;  %v572_v39 = vrot.slane %v532_v35, %v2435_v26  ;;  %v539_v40 = vrot.slane %v532_v35, %v2423_v13  ;;  %v583_v41 = vrot.slane %v532_v35, %v2439_v30 }
 0x13b   : > { %v594_v42 = vrot.slane %v532_v35, %v2443_v32  ;;  %v605_v43 = vrot.slane %v532_v35, %v2448_v34  ;;  %v561_v45 = vrot.slane %v532_v35, %v2431_v20  ;;  %v616_v46 = vrot.slane %v532_v35, %v2458_v44 }
 0x13c   : > { %v704_v47 = vrot.slane %v533_v16, %v2458_v44  ;;  %v423_v14 = vrot.slane %v2463_v48, %v2423_v13  ;;  %v443_v16 = vrot.slane %v2463_v48, %v2443_v32  ;;  %v523_v13 = vadd.f32 %v467_v53, %v2465_v49 }
 0x13d   : > { %v431_v26 = vrot.slane %v2463_v48, %v2431_v20  ;;  %v451_v35 = vrot.slane %v2463_v48, %v2458_v44  ;;  %v2579_v50 = vadd.f32 %v439_v15, %v2463_v48 }
 0x13e   : > { %633 = vbcast.lane.b32.xlu1 %v627_v18, 264  ;;  %655 = vbcast.lane.b32.xlu0 %v649_v25, 264  ;;  %v2539_v30 = vadd.f32 %v423_v14, %v2463_v48  ;;  %v2545_v32 = vadd.f32 %v423_v14, %v2465_v49  ;;  %v2552_v34 = vadd.f32 %v443_v16, %v2465_v49 }
 0x13f   : > { %v2590_v53 = vadd.f32 %v451_v35, %v2463_v48 }
 0x142   : > { %640 = vbcast.lane.b32.xlu1 %v638_v19, 256  ;;  %666 = vbcast.lane.b32.xlu0 %v660_v29, 264  ;;  %v2522_v19 = vadd.f32 %v427_v56, %v2465_v49 }
 0x146   : > { %651 = vbcast.lane.b32.xlu1 %v649_v25, 256  ;;  %677 = vbcast.lane.b32.xlu0 %v671_v31, 264  ;;  %v2529_v25 = vadd.f32 %v475_v55, %v2465_v49 }
 0x14a   : > { %662 = vbcast.lane.b32.xlu1 %v660_v29, 256  ;;  %688 = vbcast.lane.b32.xlu0 %v682_v33, 264  ;;  %v2535_v29 = vadd.f32 %v479_v59, %v2465_v49 }
 0x14e   : > { %673 = vbcast.lane.b32.xlu1 %v671_v31, 256  ;;  %699 = vbcast.lane.b32.xlu0 %v693_v36, 264  ;;  %v2542_v31 = vadd.f32 %v439_v15, %v2465_v49 }
 0x152   : > { %684 = vbcast.lane.b32.xlu1 %v682_v33, 256  ;;  %552 = vbcast.lane.b32.xlu0 %v550_v37, 256 }
 0x156   : > { %695 = vbcast.lane.b32.xlu1 %v693_v36, 256  ;;  %578 = vbcast.lane.b32.xlu0 %v572_v39, 264 }
 0x15a   : > { %541 = vbcast.lane.b32.xlu1 %v539_v40, 256  ;;  %589 = vbcast.lane.b32.xlu0 %v583_v41, 264 }
 0x15e   : > { %545 = vbcast.lane.b32.xlu1 %v539_v40, 264  ;;  %600 = vbcast.lane.b32.xlu0 %v594_v42, 264  ;;  %v2563_v40 = vadd.f32 %v431_v26, %v2465_v49 }
 0x162   : > { %556 = vbcast.lane.b32.xlu1 %v550_v37, 264  ;;  %611 = vbcast.lane.b32.xlu0 %v605_v43, 264 }
 0x166   : > { %563 = vbcast.lane.b32.xlu1 %v561_v45, 256  ;;  %622 = vbcast.lane.b32.xlu0 %v616_v46, 264 }
 0x16a   : > { %567 = vbcast.lane.b32.xlu1 %v561_v45, 264  ;;  %710 = vbcast.lane.b32.xlu0 %v704_v47, 264  ;;  %v2569_v45 = vadd.f32 %v435_v63, %v2463_v48 }
 0x16e   : > { %574 = vbcast.lane.b32.xlu1 %v572_v39, 256  ;;  %v2560_v39 = vadd.f32 %v431_v26, %v2463_v48 }
 0x172   : > { %585 = vbcast.lane.b32.xlu1 %v583_v41, 256  ;;  %v483_v41 = vrot.slane %v2465_v49, %v2458_v44  ;;  %v2584_v44 = vadd.f32 %v443_v16, %v2463_v48 }
 0x176   : > { %596 = vbcast.lane.b32.xlu1 %v594_v42, 256 }
 0x17a   : > { %607 = vbcast.lane.b32.xlu1 %v605_v43, 256 }
 0x17e   : > { %618 = vbcast.lane.b32.xlu1 %v616_v46, 256  ;;  %v2573_v46 = vadd.f32 %v451_v35, %v2465_v49 }
 0x182   : > { %706 = vbcast.lane.b32.xlu1 %v704_v47, 256  ;;  %v2576_v47 = vadd.f32 %v483_v41, %v2465_v49  ;;  %v2597_v49 = vadd.f32 %v483_v41, %v2463_v48 }
 0x1ac   : > { %v630_v0 = vpop.permute.xlu1 %629  ;;  %v645_v1 = vpop.permute.xlu0 %644 }
 0x1ad   : > { %v760_v6 = vsub.f32 %v516_v57, %v630_v0  ;;  %v763_v7 = vsub.f32 %v519_v58, %v645_v1 }
 0x1af   : > { %v2517_v17 = vmax.f32 %v760_v6, 1e-12  ;;  %v2519_v18 = vmax.f32 %v763_v7, 1e-12 }
 0x1b0   : > { %v634_v22 = vpop.permute.xlu1 %633  ;;  %v656_v23 = vpop.permute.xlu0 %655 }
 0x1b1   : > { %1889 = vrsqrt.f32 %v2517_v17  ;;  %v761_v27 = vsub.f32 %v517_v2, %v634_v22  ;;  %v765_v28 = vsub.f32 %v521_v8, %v656_v23  ;;  %vm922_vm2 = vcmp.eq.f32.partialorder %v2517_v17, inf }
 0x1b2   : > { %1891 = vrsqrt.f32 %v2519_v18  ;;  %vm924_vm3 = vcmp.eq.f32.partialorder %v2517_v17, 0.0  ;;  %v925_v59 = vand.u32 2147483648, %v2517_v17  ;;  %vm943_vm5 = vcmp.eq.f32.partialorder %v2519_v18, inf }
 0x1b3   : > { %v2547_v33 = vmax.f32 %v761_v27, 1e-12  ;;  %v2549_v20 = vmax.f32 %v765_v28, 1e-12  ;;  %vm945_vm6 = vcmp.eq.f32.partialorder %v2519_v18, 0.0 }
 0x1b4   : > { %v641_v36 = vpop.permute.xlu1 %640  ;;  %v667_v37 = vpop.permute.xlu0 %666 }
 0x1b5   : > { %1893 = vrsqrt.f32 %v2547_v33  ;;  %v762_v42 = vsub.f32 %v518_v60, %v641_v36  ;;  %v767_v43 = vsub.f32 %v523_v13, %v667_v37  ;;  %vm929_vm4 = vcmp.eq.f32.partialorder %v2547_v33, inf }
 0x1b6   : > { %1895 = vrsqrt.f32 %v2549_v20  ;;  %v946_v60 = vand.u32 2147483648, %v2519_v18  ;;  %vm931_vm7 = vcmp.eq.f32.partialorder %v2547_v33, 0.0  ;;  %v932_v48 = vand.u32 2147483648, %v2547_v33 }
 0x1b7   : > { %v2581_v51 = vmax.f32 %v762_v42, 1e-12  ;;  %v2592_v54 = vmax.f32 %v767_v43, 1e-12  ;;  %vm957_vm8 = vcmp.eq.f32.partialorder %v2549_v20, inf  ;;  %vm959_vm9 = vcmp.eq.f32.partialorder %v2549_v20, 0.0 }
 0x1b8   : > { %v652_v55 = vpop.permute.xlu1 %651  ;;  %v678_v56 = vpop.permute.xlu0 %677  ;;  %v960_v8 = vand.u32 2147483648, %v2549_v20 }
 0x1b9   : > { %1897 = vrsqrt.f32 %v2581_v51  ;;  %v764_v57 = vsub.f32 %v2487_v61, %v652_v55  ;;  %v769_v58 = vsub.f32 %v525_v24, %v678_v56  ;;  %vm936_vm10 = vcmp.eq.f32.partialorder %v2581_v51, inf }
 0x1ba   : > { %1899 = vrsqrt.f32 %v2592_v54  ;;  %vm938_vm11 = vcmp.eq.f32.partialorder %v2581_v51, 0.0  ;;  %v939_v22 = vand.u32 2147483648, %v2581_v51  ;;  %v974_v23 = vand.u32 2147483648, %v2592_v54 }
 0x1bb   : > { %v1890_v63 = vpop.eup %1889  ;;  %v2606_v0 = vmax.f32 %v764_v57, 1e-12  ;;  %v2612_v1 = vmax.f32 %v769_v58, 1e-12  ;;  %vm971_vm14 = vcmp.eq.f32.partialorder %v2592_v54, inf  ;;  %vm973_vm15 = vcmp.eq.f32.partialorder %v2592_v54, 0.0 }
 0x1bc   : > { %v1892_v61 = vpop.eup %1891  ;;  %v663_v2 = vpop.permute.xlu1 %662  ;;  %v921_v7 = vmul.f32 %v1890_v63, %v2517_v17 }
 0x1bd   : > { %v689_v6 = vpop.permute.xlu0 %688  ;;  %1901 = vrsqrt.f32 %v2606_v0  ;;  %v766_v14 = vsub.f32 %v2490_v62, %v663_v2  ;;  %v942_v16 = vmul.f32 %v1892_v61, %v2519_v18  ;;  %vm950_vm12 = vcmp.eq.f32.partialorder %v2606_v0, inf }
 0x1be   : > { %v771_v15 = vsub.f32 %v2529_v25, %v689_v6  ;;  %v923_v21 = vsel %vm922_vm2, %v2517_v17, %v921_v7  ;;  %1903 = vrsqrt.f32 %v2612_v1  ;;  %vm952_vm13 = vcmp.eq.f32.partialorder %v2606_v0, 0.0 }
 0x1bf   : > { %v1894_v13 = vpop.eup %1893  ;;  %v2628_v24 = vmax.f32 %v766_v14, 1e-12  ;;  %v926_v25 = vsel %vm924_vm3, %v925_v59, %v923_v21  ;;  %v944_v26 = vsel %vm943_vm5, %v2519_v18, %v942_v16  ;;  %v953_v18 = vand.u32 2147483648, %v2606_v0 }
 0x1c0   : > { %v2630_v62 = vmax.f32 %v771_v15, 1e-12  ;;  %v1896_v27 = vpop.eup %1895  ;;  %v674_v28 = vpop.permute.xlu1 %673  ;;  %v1048_v36 = vmul.f32 0.5, %v926_v25  ;;  %v928_v37 = vmul.f32 %v1894_v13, %v2547_v33  ;;  %v947_v41 = vsel %vm945_vm6, %v946_v60, %v944_v26 }
 0x1c1   : > { %v700_v35 = vpop.permute.xlu0 %699  ;;  %1905 = vrsqrt.f32 %v2628_v24  ;;  %v768_v17 = vsub.f32 %v2496_v3, %v674_v28  ;;  %v1051_v43 = vmul.f32 0.5, %v947_v41  ;;  %v956_v56 = vmul.f32 %v1896_v27, %v2549_v20 }
 0x1c2   : > { %v773_v42 = vsub.f32 %v2535_v29, %v700_v35  ;;  %1907 = vrsqrt.f32 %v2630_v62  ;;  %v930_v55 = vsel %vm929_vm4, %v2547_v33, %v928_v37  ;;  %vm964_vm1 = vcmp.eq.f32.partialorder %v2628_v24, inf }
 0x1c3   : > { %v1898_v57 = vpop.eup %1897  ;;  %v2652_v58 = vmax.f32 %v768_v17, 1e-12  ;;  %1909 = vtanh.f32 %v1048_v36  ;;  %v933_v29 = vsel %vm931_vm7, %v932_v48, %v930_v55  ;;  %v958_v2 = vsel %vm957_vm8, %v2549_v20, %v956_v56 }
 0x1c4   : > { %v2654_v3 = vmax.f32 %v773_v42, 1e-12  ;;  %v685_v59 = vpop.permute.xlu1 %684  ;;  %v1049_v63 = vmul.f32 0.5, %v933_v29  ;;  %v935_v61 = vmul.f32 %v1898_v57, %v2581_v51  ;;  %1911 = vtanh.f32 %v1051_v43  ;;  %v1900_v7 = vpop.eup %1899 }
 0x1c5   : > { %v553_v60 = vpop.permute.xlu0 %552  ;;  %1913 = vrsqrt.f32 %v2652_v58  ;;  %v770_v6 = vsub.f32 %v2499_v4, %v685_v59  ;;  %v961_v48 = vsel %vm959_vm9, %v960_v8, %v958_v2  ;;  %vm966_vm2 = vcmp.eq.f32.partialorder %v2628_v24, 0.0 }
 0x1c6   : > { %v746_v33 = vsub.f32 %v2502_v5, %v553_v60  ;;  %1915 = vrsqrt.f32 %v2654_v3  ;;  %v937_v14 = vsel %vm936_vm10, %v2581_v51, %v935_v61  ;;  %v1053_v15 = vmul.f32 0.5, %v961_v48 }
 0x1c7   : > { %v1902_v16 = vpop.eup %1901  ;;  %v2674_v21 = vmax.f32 %v770_v6, 1e-12  ;;  %1917 = vtanh.f32 %v1049_v63  ;;  %v940_v4 = vsel %vm938_vm11, %v939_v22, %v937_v14  ;;  %v970_v28 = vmul.f32 %v1900_v7, %v2592_v54 }
 0x1c8   : > { %v2676_v13 = vmax.f32 %v746_v33, 1e-12  ;;  %v696_v5 = vpop.permute.xlu1 %695  ;;  %v1050_v8 = vmul.f32 0.5, %v940_v4  ;;  %v949_v25 = vmul.f32 %v1902_v16, %v2606_v0  ;;  %1919 = vtanh.f32 %v1053_v15  ;;  %v1904_v35 = vpop.eup %1903 }
 0x1c9   : > { %v579_v20 = vpop.permute.xlu0 %578  ;;  %1921 = vrsqrt.f32 %v2674_v21  ;;  %v772_v26 = vsub.f32 %v2506_v9, %v696_v5  ;;  %v967_v22 = vand.u32 2147483648, %v2628_v24  ;;  %vm978_vm3 = vcmp.eq.f32.partialorder %v2652_v58, inf }
 0x1ca   : > { %v751_v27 = vsub.f32 %v2509_v11, %v579_v20  ;;  %1923 = vrsqrt.f32 %v2676_v13  ;;  %v951_v51 = vsel %vm950_vm12, %v2606_v0, %v949_v25  ;;  %vm980_vm4 = vcmp.eq.f32.partialorder %v2652_v58, 0.0 }
 0x1cb   : > { %v1906_v36 = vpop.eup %1905  ;;  %v2692_v37 = vmax.f32 %v772_v26, 1e-12  ;;  %1925 = vtanh.f32 %v1050_v8  ;;  %v954_v9 = vsel %vm952_vm13, %v953_v18, %v951_v51  ;;  %v972_v56 = vsel %vm971_vm14, %v2592_v54, %v970_v28 }
 0x1cc   : > { %v2694_v41 = vmax.f32 %v751_v27, 1e-12  ;;  %v2699_v11 = vpop.eup %1907  ;;  %v542_v17 = vpop.permute.xlu1 %541  ;;  %v1052_v43 = vmul.f32 0.5, %v954_v9  ;;  %v963_v55 = vmul.f32 %v1906_v36, %v2628_v24  ;;  %v981_v57 = vand.u32 2147483648, %v2652_v58 }
 0x1cd   : > { %v590_v42 = vpop.permute.xlu0 %589  ;;  %v1910_v29 = vpop.eup %1909  ;;  %1927 = vrsqrt.f32 %v2692_v37  ;;  %v744_v0 = vsub.f32 %v2539_v30, %v542_v17  ;;  %v975_v59 = vsel %vm973_vm15, %v974_v23, %v972_v56  ;;  %v984_v15 = vmul.f32 %v1904_v35, %v2612_v1 }
 0x1ce   : > { %v753_v18 = vsub.f32 %v2542_v31, %v590_v42  ;;  %v1912_v60 = vpop.eup %1911  ;;  %1929 = vrsqrt.f32 %v2694_v41  ;;  %v1112_v63 = vsub.f32 1.0, %v1910_v29  ;;  %v965_v61 = vsel %vm964_vm1, %v2628_v24, %v963_v55 }
 0x1cf   : > { %v1055_v2 = vmul.f32 0.5, %v975_v59  ;;  %v1914_v6 = vpop.eup %1913  ;;  %v2717_v33 = vmax.f32 %v744_v0, 1e-12  ;;  %v1115_v31 = vsub.f32 1.0, %v1912_v60  ;;  %1931 = vtanh.f32 %v1052_v43 }
 0x1d0   : > { %v2719_v30 = vmax.f32 %v753_v18, 1e-12  ;;  %v2721_v48 = vpop.eup %1915  ;;  %1209 = vperm.xlu0 %1887, %v1112_v63   ;;  %v546_v54 = vpop.permute.xlu1 %545  ;;  %v968_v7 = vsel %vm966_vm2, %v967_v22, %v965_v61  ;;  %v977_v14 = vmul.f32 %v1914_v6, %v2652_v58  ;;  %vm985_vm5 = vcmp.eq.f32.partialorder %v2612_v1, inf }
 0x1d1   : > { %v601_v23 = vpop.permute.xlu0 %600  ;;  %1933 = vtanh.f32 %v1055_v2  ;;  %v1918_v16 = vpop.eup %1917  ;;  %v745_v4 = vsub.f32 %v2545_v32, %v546_v54  ;;  %v1054_v20 = vmul.f32 0.5, %v968_v7  ;;  %v986_v36 = vsel %vm985_vm5, %v2612_v1, %v984_v15 }
 0x1d2   : > { %1935 = vrsqrt.f32 %v2717_v33  ;;  %v755_v5 = vsub.f32 %v2552_v34, %v601_v23  ;;  %v1920_v8 = vpop.eup %1919  ;;  %v1113_v25 = vsub.f32 1.0, %v1918_v16  ;;  %v979_v24 = vsel %vm978_vm3, %v2652_v58, %v977_v14 }
 0x1d3   : > { %1937 = vrsqrt.f32 %v2719_v30  ;;  %v1922_v26 = vpop.eup %1921  ;;  %v2735_v27 = vmax.f32 %v745_v4, 1e-12  ;;  %v1117_v35 = vsub.f32 1.0, %v1920_v8  ;;  %v982_v22 = vsel %vm980_vm4, %v981_v57, %v979_v24 }
 0x1d4   : > { %v2737_v28 = vmax.f32 %v755_v5, 1e-12  ;;  %1939 = vtanh.f32 %v1054_v20  ;;  %v2739_v32 = vpop.eup %1923  ;;  %1212 = vperm.xlu1 %1888, %v1113_v25   ;;  %v557_v34 = vpop.permute.xlu1 %556  ;;  %vm987_vm6 = vcmp.eq.f32.partialorder %v2612_v1, 0.0  ;;  %v988_v9 = vand.u32 2147483648, %v2612_v1 }
 0x1d5   : > { %v612_v51 = vpop.permute.xlu0 %611  ;;  %v1926_v17 = vpop.eup %1925  ;;  %1941 = vrsqrt.f32 %v2735_v27  ;;  %v747_v42 = vsub.f32 %v2522_v19, %v557_v34  ;;  %v1056_v55 = vmul.f32 0.5, %v982_v22  ;;  %v991_v58 = vmul.f32 %v1922_v26, %v2674_v21 }
 0x1d6   : > { %v757_v43 = vsub.f32 %v2557_v38, %v612_v51  ;;  %1943 = vrsqrt.f32 %v2737_v28  ;;  %v1114_v56 = vsub.f32 1.0, %v1926_v17  ;;  %v989_v29 = vsel %vm987_vm6, %v988_v9, %v986_v36 }
 0x1d7   : > { %v1928_v57 = vpop.eup %1927  ;;  %v2751_v0 = vmax.f32 %v747_v42, 1e-12  ;;  %1945 = vtanh.f32 %v1056_v55  ;;  %v1057_v1 = vmul.f32 0.5, %v989_v29  ;;  %vm992_vm7 = vcmp.eq.f32.partialorder %v2674_v21, inf }
 0x1d8   : > { %v2753_v18 = vmax.f32 %v757_v43, 1e-12  ;;  %v2755_v59 = vpop.eup %1929  ;;  %1215 = vperm.xlu0 %1887, %v1114_v56   ;;  %1218 = vperm.xlu1 %1888, %v1115_v31   ;;  %v564_v19 = vpop.permute.xlu1 %563  ;;  %vm994_vm8 = vcmp.eq.f32.partialorder %v2674_v21, 0.0  ;;  %v995_v60 = vand.u32 2147483648, %v2674_v21  ;;  %v998_v63 = vmul.f32 %v2699_v11, %v2630_v62 }
 0x1d9   : > { %v623_v38 = vpop.permute.xlu0 %622  ;;  %v1932_v61 = vpop.eup %1931  ;;  %1947 = vrsqrt.f32 %v2751_v0  ;;  %v748_v2 = vsub.f32 %v2560_v39, %v564_v19  ;;  %v993_v31 = vsel %vm992_vm7, %v2674_v21, %v991_v58  ;;  %vm999_vm9 = vcmp.eq.f32.partialorder %v2630_v62, inf }
 0x1da   : > { %v759_v6 = vsub.f32 %v2573_v46, %v623_v38  ;;  %1949 = vrsqrt.f32 %v2753_v18  ;;  %v1116_v23 = vsub.f32 1.0, %v1932_v61  ;;  %v996_v7 = vsel %vm994_vm8, %v995_v60, %v993_v31 }
 0x1db   : > { %v1934_v54 = vpop.eup %1933  ;;  %v2768_v15 = vmax.f32 %v748_v2, 1e-12  ;;  %1951 = vtanh.f32 %v1057_v1  ;;  %v1058_v21 = vmul.f32 0.5, %v996_v7  ;;  %v1000_v5 = vsel %vm999_vm9, %v2630_v62, %v998_v63 }
 0x1dc   : > { %v1936_v14 = vpop.eup %1935  ;;  %v2770_v11 = vmax.f32 %v759_v6, 1e-12  ;;  %v1119_v16 = vsub.f32 1.0, %v1934_v54  ;;  %1221 = vperm.xlu0 %1887, %v1116_v23   ;;  %1224 = vperm.xlu1 %1888, %v1117_v35   ;;  %v568_v39 = vpop.permute.xlu1 %567  ;;  %vm1001_vm10 = vcmp.eq.f32.partialorder %v2630_v62, 0.0  ;;  %v1002_v20 = vand.u32 2147483648, %v2630_v62 }
 0x1dd   : > { %v2772_v4 = vpop.eup %1937  ;;  %v711_v46 = vpop.permute.xlu0 %710  ;;  %1953 = vrsqrt.f32 %v2768_v15  ;;  %v749_v25 = vsub.f32 %v2563_v40, %v568_v39  ;;  %v1005_v26 = vmul.f32 %v1928_v57, %v2692_v37  ;;  %vm1006_vm11 = vcmp.eq.f32.partialorder %v2692_v37, inf }
 0x1de   : > { %v1940_v8 = vpop.eup %1939  ;;  %v775_v24 = vsub.f32 %v2576_v47, %v711_v46  ;;  %1955 = vrsqrt.f32 %v2770_v11  ;;  %v1003_v34 = vsel %vm1001_vm10, %v1002_v20, %v1000_v5  ;;  %vm1008_vm12 = vcmp.eq.f32.partialorder %v2692_v37, 0.0 }
 0x1df   : > { %v1118_v35 = vsub.f32 1.0, %v1940_v8  ;;  %v1942_v51 = vpop.eup %1941  ;;  %v2783_v22 = vmax.f32 %v749_v25, 1e-12  ;;  %1957 = vtanh.f32 %v1058_v21  ;;  %v1059_v62 = vmul.f32 0.5, %v1003_v34 }
 0x1e0   : > { %v2785_v36 = vmax.f32 %v775_v24, 1e-12  ;;  %v2787_v9 = vpop.eup %1943  ;;  %1230 = vperm.xlu1 %1888, %v1119_v16   ;;  %v575_v40 = vpop.permute.xlu1 %574  ;;  %v1007_v47 = vsel %vm1006_vm11, %v2692_v37, %v1005_v26  ;;  %v1009_v17 = vand.u32 2147483648, %v2692_v37  ;;  %v1012_v42 = vmul.f32 %v2721_v48, %v2654_v3 }
 0x1e1   : > { %1227 = vperm.xlu0 %1887, %v1118_v35   ;;  %v1946_v43 = vpop.eup %1945  ;;  %1959 = vrsqrt.f32 %v2783_v22  ;;  %v750_v55 = vsub.f32 %v2569_v45, %v575_v40  ;;  %vm1013_vm13 = vcmp.eq.f32.partialorder %v2654_v3, inf  ;;  %vm1015_vm14 = vcmp.eq.f32.partialorder %v2654_v3, 0.0 }
 0x1e2   : > { %1961 = vrsqrt.f32 %v2785_v36  ;;  %v1120_v56 = vsub.f32 1.0, %v1946_v43  ;;  %v1010_v29 = vsel %vm1008_vm12, %v1009_v17, %v1007_v47  ;;  %v1014_v58 = vsel %vm1013_vm13, %v2654_v3, %v1012_v42 }
 0x1e3   : > { %v1948_v57 = vpop.eup %1947  ;;  %v2800_v37 = vmax.f32 %v750_v55, 1e-12  ;;  %1963 = vtanh.f32 %v1059_v62  ;;  %v1060_v48 = vmul.f32 0.5, %v1010_v29  ;;  %v1016_v1 = vand.u32 2147483648, %v2654_v3 }
 0x1e4   : > { %v2803_v19 = vpop.eup %1949  ;;  %v586_v45 = vpop.permute.xlu1 %585  ;;  %v809_v38 = vmul.f32 %v1936_v14, %v2717_v33  ;;  %vm810_vm15 = vcmp.eq.f32.partialorder %v2717_v33, inf  ;;  %vm812_vm1 = vcmp.eq.f32.partialorder %v2717_v33, 0.0  ;;  %v813_v60 = vand.u32 2147483648, %v2717_v33 }
 0x1e5   : > { %1233 = vperm.xlu0 %1887, %v1120_v56   ;;  %v1952_v63 = vpop.eup %1951  ;;  %1965 = vrsqrt.f32 %v2800_v37  ;;  %v752_v61 = vsub.f32 %v2579_v50, %v586_v45  ;;  %v1017_v2 = vsel %vm1015_vm14, %v1016_v1, %v1014_v58  ;;  %v816_v6 = vmul.f32 %v1942_v51, %v2735_v27 }
 0x1e6   : > { %v1121_v31 = vsub.f32 1.0, %v1952_v63  ;;  %1967 = vtanh.f32 %v1060_v48  ;;  %v1061_v54 = vmul.f32 0.5, %v1017_v2  ;;  %v811_v23 = vsel %vm810_vm15, %v2717_v33, %v809_v38 }
 0x1e7   : > { %v1954_v7 = vpop.eup %1953  ;;  %v2815_v14 = vmax.f32 %v752_v61, 1e-12  ;;  %v814_v16 = vsel %vm812_vm1, %v813_v60, %v811_v23  ;;  %vm817_vm2 = vcmp.eq.f32.partialorder %v2735_v27, inf  ;;  %vm819_vm3 = vcmp.eq.f32.partialorder %v2735_v27, 0.0 }
 0x1e8   : > { %v2819_v39 = vpop.eup %1955  ;;  %1236 = vperm.xlu1 %1888, %v1121_v31   ;;  %v597_v50 = vpop.permute.xlu1 %596  ;;  %1969 = vtanh.f32 %v1061_v54  ;;  %v1032_v3 = vmul.f32 0.5, %v814_v16  ;;  %v818_v46 = vsel %vm817_vm2, %v2735_v27, %v816_v6  ;;  %v820_v21 = vand.u32 2147483648, %v2735_v27 }
 0x1e9   : > { %v1958_v5 = vpop.eup %1957  ;;  %1971 = vrsqrt.f32 %v2815_v14  ;;  %v754_v33 = vsub.f32 %v2584_v44, %v597_v50  ;;  %v823_v20 = vmul.f32 %v2739_v32, %v2676_v13  ;;  %vm824_vm4 = vcmp.eq.f32.partialorder %v2676_v13, inf }
 0x1ea   : > { %v1122_v8 = vsub.f32 1.0, %v1958_v5  ;;  %1973 = vtanh.f32 %v1032_v3  ;;  %v821_v25 = vsel %vm819_vm3, %v820_v21, %v818_v46  ;;  %vm826_vm5 = vcmp.eq.f32.partialorder %v2676_v13, 0.0 }
 0x1eb   : > { %v1960_v24 = vpop.eup %1959  ;;  %v2829_v26 = vmax.f32 %v754_v33, 1e-12  ;;  %v1033_v35 = vmul.f32 0.5, %v821_v25  ;;  %v825_v27 = vsel %vm824_vm4, %v2676_v13, %v823_v20  ;;  %v827_v34 = vand.u32 2147483648, %v2676_v13 }
 0x1ec   : > { %v2833_v51 = vpop.eup %1961  ;;  %1239 = vperm.xlu0 %1887, %v1122_v8   ;;  %v608_v44 = vpop.permute.xlu1 %607  ;;  %v830_v32 = vmul.f32 %v1948_v57, %v2751_v0  ;;  %vm831_vm6 = vcmp.eq.f32.partialorder %v2751_v0, inf  ;;  %vm833_vm7 = vcmp.eq.f32.partialorder %v2751_v0, 0.0  ;;  %v834_v62 = vand.u32 2147483648, %v2751_v0 }
 0x1ed   : > { %v1964_v40 = vpop.eup %1963  ;;  %1975 = vrsqrt.f32 %v2829_v26  ;;  %v756_v47 = vsub.f32 %v2587_v52, %v608_v44  ;;  %v828_v17 = vsel %vm826_vm5, %v827_v34, %v825_v27  ;;  %v837_v42 = vmul.f32 %v1954_v7, %v2768_v15 }
 0x1ee   : > { %v1123_v43 = vsub.f32 1.0, %v1964_v40  ;;  %1977 = vtanh.f32 %v1033_v35  ;;  %v1034_v55 = vmul.f32 0.5, %v828_v17  ;;  %v832_v56 = vsel %vm831_vm6, %v2751_v0, %v830_v32 }
 0x1ef   : > { %v1966_v29 = vpop.eup %1965  ;;  %v2845_v58 = vmax.f32 %v756_v47, 1e-12  ;;  %v835_v57 = vsel %vm833_vm7, %v834_v62, %v832_v56  ;;  %vm838_vm8 = vcmp.eq.f32.partialorder %v2768_v15, inf  ;;  %vm840_vm9 = vcmp.eq.f32.partialorder %v2768_v15, 0.0 }
 0x1f0   : > { %v1968_v48 = vpop.eup %1967  ;;  %1242 = vperm.xlu1 %1888, %v1123_v43   ;;  %v619_v52 = vpop.permute.xlu1 %618  ;;  %1979 = vtanh.f32 %v1034_v55  ;;  %v1035_v13 = vmul.f32 0.5, %v835_v57  ;;  %v839_v1 = vsel %vm838_vm8, %v2768_v15, %v837_v42  ;;  %v841_v45 = vand.u32 2147483648, %v2768_v15 }
 0x1f1   : > { %v1124_v38 = vsub.f32 1.0, %v1968_v48  ;;  %1981 = vrsqrt.f32 %v2845_v58  ;;  %v758_v0 = vsub.f32 %v2590_v53, %v619_v52  ;;  %v844_v60 = vmul.f32 %v1960_v24, %v2783_v22 }
 0x1f2   : > { %v1970_v63 = vpop.eup %1969  ;;  %1983 = vtanh.f32 %v1035_v13  ;;  %v842_v61 = vsel %vm840_vm9, %v841_v45, %v839_v1  ;;  %vm845_vm10 = vcmp.eq.f32.partialorder %v2783_v22, inf  ;;  %vm847_vm11 = vcmp.eq.f32.partialorder %v2783_v22, 0.0 }
 0x1f3   : > { %v1972_v2 = vpop.eup %1971  ;;  %1245 = vperm.xlu0 %1887, %v1124_v38   ;;  %v1125_v6 = vsub.f32 1.0, %v1970_v63  ;;  %v2856_v31 = vmax.f32 %v758_v0, 1e-12  ;;  %v1036_v15 = vmul.f32 0.5, %v842_v61  ;;  %v846_v54 = vsel %vm845_vm10, %v2783_v22, %v844_v60 }
 0x1f4   : > { %v1974_v23 = vpop.eup %1973  ;;  %v707_v7 = vpop.permute.xlu1 %706  ;;  %v848_v53 = vand.u32 2147483648, %v2783_v22  ;;  %v851_v16 = vmul.f32 %v1966_v29, %v2800_v37  ;;  %vm852_vm12 = vcmp.eq.f32.partialorder %v2800_v37, inf  ;;  %vm854_vm13 = vcmp.eq.f32.partialorder %v2800_v37, 0.0 }
 0x1f5   : > { %1248 = vperm.xlu1 %1888, %v1125_v6   ;;  %v1096_v50 = vsub.f32 1.0, %v1974_v23  ;;  %1985 = vrsqrt.f32 %v2856_v31  ;;  %v774_v3 = vsub.f32 %v2597_v49, %v707_v7  ;;  %v855_v46 = vand.u32 2147483648, %v2800_v37 }
 0x1f6   : > { %1987 = vtanh.f32 %v1036_v15  ;;  %v849_v21 = vsel %vm847_vm11, %v848_v53, %v846_v54  ;;  %v853_v5 = vsel %vm852_vm12, %v2800_v37, %v851_v16  ;;  %v858_v33 = vmul.f32 %v2755_v59, %v2694_v41 }
 0x1f7   : > { %v1976_v20 = vpop.eup %1975  ;;  %v2871_v8 = vmax.f32 %v774_v3, 1e-12  ;;  %v1037_v25 = vmul.f32 0.5, %v849_v21  ;;  %v856_v24 = vsel %vm854_vm13, %v855_v46, %v853_v5  ;;  %vm859_vm14 = vcmp.eq.f32.partialorder %v2694_v41, inf }
 0x1f8   : > { %v1978_v35 = vpop.eup %1977  ;;  %v1038_v49 = vmul.f32 0.5, %v856_v24  ;;  %v860_v27 = vsel %vm859_vm14, %v2694_v41, %v858_v33  ;;  %vm861_vm15 = vcmp.eq.f32.partialorder %v2694_v41, 0.0  ;;  %v862_v22 = vand.u32 2147483648, %v2694_v41 }
 0x1f9   : > { %1161 = vperm.xlu1 %1888, %v1096_v50   ;;  %v1097_v37 = vsub.f32 1.0, %v1978_v35  ;;  %1989 = vrsqrt.f32 %v2871_v8  ;;  %v865_v59 = vmul.f32 %v1972_v2, %v2815_v14  ;;  %vm866_vm1 = vcmp.eq.f32.partialorder %v2815_v14, inf }
 0x1fa   : > { %v1980_v34 = vpop.eup %1979  ;;  %1991 = vtanh.f32 %v1037_v25  ;;  %v863_v44 = vsel %vm861_vm15, %v862_v22, %v860_v27  ;;  %vm868_vm2 = vcmp.eq.f32.partialorder %v2815_v14, 0.0  ;;  %v869_v32 = vand.u32 2147483648, %v2815_v14 }
 0x1fb   : > { %v1982_v62 = vpop.eup %1981  ;;  %1164 = vperm.xlu0 %1887, %v1097_v37   ;;  %v1098_v40 = vsub.f32 1.0, %v1980_v34  ;;  %1993 = vtanh.f32 %v1038_v49  ;;  %v1039_v41 = vmul.f32 0.5, %v863_v44  ;;  %v867_v47 = vsel %vm866_vm1, %v2815_v14, %v865_v59 }
 0x1fc   : > { %v1984_v17 = vpop.eup %1983  ;;  %v870_v42 = vsel %vm868_vm2, %v869_v32, %v867_v47  ;;  %v872_v43 = vmul.f32 %v2772_v4, %v2719_v30  ;;  %vm873_vm3 = vcmp.eq.f32.partialorder %v2719_v30, inf  ;;  %vm875_vm4 = vcmp.eq.f32.partialorder %v2719_v30, 0.0 }
 0x1fd   : > { %1167 = vperm.xlu1 %1888, %v1098_v40   ;;  %v1099_v55 = vsub.f32 1.0, %v1984_v17  ;;  %1995 = vtanh.f32 %v1039_v41  ;;  %v1040_v56 = vmul.f32 0.5, %v870_v42  ;;  %v876_v29 = vand.u32 2147483648, %v2719_v30 }
 0x1fe   : > { %v874_v57 = vsel %vm873_vm3, %v2719_v30, %v872_v43  ;;  %v879_v48 = vmul.f32 %v1976_v20, %v2829_v26  ;;  %vm880_vm5 = vcmp.eq.f32.partialorder %v2829_v26, inf  ;;  %vm882_vm6 = vcmp.eq.f32.partialorder %v2829_v26, 0.0 }
 0x1ff   : > { %v1986_v14 = vpop.eup %1985  ;;  %1997 = vtanh.f32 %v1040_v56  ;;  %v877_v4 = vsel %vm875_vm4, %v876_v29, %v874_v57  ;;  %v883_v52 = vand.u32 2147483648, %v2829_v26  ;;  %v886_v13 = vmul.f32 %v2787_v9, %v2737_v28 }
 0x200   : > { %v1988_v1 = vpop.eup %1987  ;;  %v1041_v45 = vmul.f32 0.5, %v877_v4  ;;  %v881_v38 = vsel %vm880_vm5, %v2829_v26, %v879_v48  ;;  %vm887_vm7 = vcmp.eq.f32.partialorder %v2737_v28, inf  ;;  %vm889_vm8 = vcmp.eq.f32.partialorder %v2737_v28, 0.0 }
 0x201   : > { %1170 = vperm.xlu1 %1888, %v1099_v55   ;;  %v1100_v30 = vsub.f32 1.0, %v1988_v1  ;;  %v884_v0 = vsel %vm882_vm6, %v883_v52, %v881_v38  ;;  %v888_v60 = vsel %vm887_vm7, %v2737_v28, %v886_v13  ;;  %v890_v63 = vand.u32 2147483648, %v2737_v28 }
 0x202   : > { %1999 = vtanh.f32 %v1041_v45  ;;  %v1042_v61 = vmul.f32 0.5, %v884_v0  ;;  %v893_v2 = vmul.f32 %v1982_v62, %v2845_v58  ;;  %vm894_vm9 = vcmp.eq.f32.partialorder %v2845_v58, inf }
 0x203   : > { %v1990_v9 = vpop.eup %1989  ;;  %1173 = vperm.xlu0 %1887, %v1100_v30   ;;  %v891_v26 = vsel %vm889_vm8, %v890_v63, %v888_v60  ;;  %vm896_vm10 = vcmp.eq.f32.partialorder %v2845_v58, 0.0  ;;  %v897_v6 = vand.u32 2147483648, %v2845_v58  ;;  %v900_v15 = vmul.f32 %v2803_v19, %v2753_v18 }
 0x204   : > { %v1992_v54 = vpop.eup %1991  ;;  %2001 = vtanh.f32 %v1042_v61  ;;  %v1043_v23 = vmul.f32 0.5, %v891_v26  ;;  %v895_v28 = vsel %vm894_vm9, %v2845_v58, %v893_v2  ;;  %vm901_vm11 = vcmp.eq.f32.partialorder %v2753_v18, inf }
 0x205   : > { %v1994_v7 = vpop.eup %1993  ;;  %v1101_v53 = vsub.f32 1.0, %v1992_v54  ;;  %v898_v16 = vsel %vm896_vm10, %v897_v6, %v895_v28  ;;  %v902_v50 = vsel %vm901_vm11, %v2753_v18, %v900_v15  ;;  %vm903_vm12 = vcmp.eq.f32.partialorder %v2753_v18, 0.0 }
 0x206   : > { %v1102_v3 = vsub.f32 1.0, %v1994_v7  ;;  %2003 = vtanh.f32 %v1043_v23  ;;  %v1044_v46 = vmul.f32 0.5, %v898_v16  ;;  %v904_v21 = vand.u32 2147483648, %v2753_v18 }
 0x207   : > { %v1996_v19 = vpop.eup %1995  ;;  %1176 = vperm.xlu1 %1888, %v1101_v53   ;;  %v907_v5 = vmul.f32 %v1986_v14, %v2856_v31  ;;  %vm908_vm13 = vcmp.eq.f32.partialorder %v2856_v31, inf  ;;  %vm910_vm14 = vcmp.eq.f32.partialorder %v2856_v31, 0.0  ;;  %v911_v58 = vand.u32 2147483648, %v2856_v31 }
 0x208   : > { %1179 = vperm.xlu0 %1887, %v1102_v3   ;;  %v1103_v33 = vsub.f32 1.0, %v1996_v19  ;;  %2005 = vtanh.f32 %v1044_v46  ;;  %v905_v20 = vsel %vm903_vm12, %v904_v21, %v902_v50  ;;  %v914_v25 = vmul.f32 %v2819_v39, %v2770_v11 }
 0x209   : > { %v1998_v24 = vpop.eup %1997  ;;  %v1045_v35 = vmul.f32 0.5, %v905_v20  ;;  %v909_v18 = vsel %vm908_vm13, %v2856_v31, %v907_v5  ;;  %vm915_vm15 = vcmp.eq.f32.partialorder %v2770_v11, inf  ;;  %vm917_vm1 = vcmp.eq.f32.partialorder %v2770_v11, 0.0 }
 0x20a   : > { %v1104_v49 = vsub.f32 1.0, %v1998_v24  ;;  %v912_v27 = vsel %vm910_vm14, %v911_v58, %v909_v18  ;;  %v916_v22 = vsel %vm915_vm15, %v2770_v11, %v914_v25  ;;  %v918_v37 = vand.u32 2147483648, %v2770_v11 }
 0x20b   : > { %1182 = vperm.xlu1 %1888, %v1103_v33   ;;  %2007 = vtanh.f32 %v1045_v35  ;;  %v1046_v59 = vmul.f32 0.5, %v912_v27  ;;  %v1019_v34 = vmul.f32 %v1990_v9, %v2871_v8  ;;  %vm1020_vm2 = vcmp.eq.f32.partialorder %v2871_v8, inf }
 0x20c   : > { %v2000_v39 = vpop.eup %1999  ;;  %1185 = vperm.xlu0 %1887, %v1104_v49   ;;  %v919_v31 = vsel %vm917_vm1, %v918_v37, %v916_v22  ;;  %vm1022_vm3 = vcmp.eq.f32.partialorder %v2871_v8, 0.0  ;;  %v1023_v44 = vand.u32 2147483648, %v2871_v8  ;;  %v1026_v32 = vmul.f32 %v2833_v51, %v2785_v36 }
 0x20d   : > { %v1105_v62 = vsub.f32 1.0, %v2000_v39  ;;  %2009 = vtanh.f32 %v1046_v59  ;;  %v1047_v11 = vmul.f32 0.5, %v919_v31  ;;  %v1021_v40 = vsel %vm1020_vm2, %v2871_v8, %v1019_v34 }
 0x20e   : > { %v2002_v41 = vpop.eup %2001  ;;  %v1024_v47 = vsel %vm1022_vm3, %v1023_v44, %v1021_v40  ;;  %vm1027_vm4 = vcmp.eq.f32.partialorder %v2785_v36, inf  ;;  %vm1029_vm5 = vcmp.eq.f32.partialorder %v2785_v36, 0.0  ;;  %v1030_v17 = vand.u32 2147483648, %v2785_v36 }
 0x20f   : > { %1188 = vperm.xlu1 %1888, %v1105_v62   ;;  %v1106_v42 = vsub.f32 1.0, %v2002_v41  ;;  %2011 = vtanh.f32 %v1047_v11  ;;  %v1062_v43 = vmul.f32 0.5, %v1024_v47  ;;  %v1028_v55 = vsel %vm1027_vm4, %v2785_v36, %v1026_v32  ;;  %v1782_v36 = vpop.f32.mrb[0].mxu0 }
 0x210   : > { %v2004_v51 = vpop.eup %2003  ;;  %v1031_v56 = vsel %vm1029_vm5, %v1030_v17, %v1028_v55  ;;  %v326_v30 = vpop.f32.mrb[1].mxu0  ;;  %vm1267_vm6 = vcmask 130112   ;;  %vm1404_vm7 = vcmask 1041409   ;;  %vm1406_vm8 = vcmask 1042434  }
 0x211   : > { %1191 = vperm.xlu0 %1887, %v1106_v42   ;;  %v1107_v29 = vsub.f32 1.0, %v2004_v51  ;;  %2013 = vtanh.f32 %v1062_v43  ;;  %v1063_v8 = vmul.f32 0.5, %v1031_v56  ;;  %v1811_v60 = vpack.c.bf16 %v1782_v36, %v326_v30 }
 0x212   : > { %v2006_v57 = vpop.eup %2005  ;;  %vm1408_vm9 = vcmask 1043459   ;;  %vm1410_vm10 = vcmask 1044484   ;;  %vm1412_vm11 = vcmask 1045509   ;;  %vm1414_vm12 = vcmask 1046534  }
 0x213   : > { %1194 = vperm.xlu1 %1888, %v1107_v29   ;;  %v1108_v48 = vsub.f32 1.0, %v2006_v57  ;;  %2015 = vtanh.f32 %v1063_v8  ;;  %1812 = vmatprep.subr.bf16.mxu0 %v1811_v60  ;;  %vm1416_vm13 = vcmask 1047559   ;;  %vm1427_vm14 = vcmask 130048  }
 0x214   : > { %1814 = vmatpush3.bf16.msra.mxu0 %v1811_v60 }
 0x215   : > { %v2008_v14 = vpop.eup %2007  ;;  %1197 = vperm.xlu0 %1887, %v1108_v48  }
 0x216   : > { %v1109_v4 = vsub.f32 1.0, %v2008_v14 }
 0x217   : > { %v2010_v52 = vpop.eup %2009 }
 0x218   : > { %1200 = vperm.xlu1 %1888, %v1109_v4   ;;  %v1110_v13 = vsub.f32 1.0, %v2010_v52 }
 0x219   : > { %v2012_v1 = vpop.eup %2011 }
 0x21a   : > { %1203 = vperm.xlu0 %1887, %v1110_v13   ;;  %v1111_v45 = vsub.f32 1.0, %v2012_v1 }
 0x21b   : > { %v2014_v38 = vpop.eup %2013 }
 0x21c   : > { %1206 = vperm.xlu1 %1888, %v1111_v45   ;;  %v1126_v0 = vsub.f32 1.0, %v2014_v38 }
 0x21d   : > { %v2016_v63 = vpop.eup %2015 }
 0x21e   : > { %1251 = vperm.xlu0 %1887, %v1126_v0   ;;  %v1127_v61 = vsub.f32 1.0, %v2016_v63 }
 0x220   : > { %1254 = vperm.xlu1 %1888, %v1127_v61  }
 0x24f   : > { %v1210_v2 = vpop.permute.xlu0 %1209 }
 0x250   : > { %v1335_v26 = vrot.slane %v1210_v2, %v2417_v10 }
 0x253   : > { %v1213_v9 = vpop.permute.xlu1 %1212 }
 0x254   : > { %v1339_v6 = vrot.slane %v1213_v9, %v2420_v12 }
 0x256   : > { %v1340_v15 = vsel %vm1267_vm6, %v1339_v6, %v1335_v26 }
 0x257   : > { %v1219_v54 = vpop.permute.xlu1 %1218  ;;  %v1216_v23 = vpop.permute.xlu0 %1215 }
 0x258   : > { %v1348_v28 = vrot.slane %v1219_v54, %v2420_v12  ;;  %v1344_v7 = vrot.slane %v1216_v23, %v2417_v10 }
 0x25a   : > { %v1349_v53 = vsel %vm1267_vm6, %v1348_v28, %v1344_v7 }
 0x25b   : > { %v1418_v16 = vsel %vm1404_vm7, %v1349_v53, %v1340_v15  ;;  %v1225_v50 = vpop.permute.xlu1 %1224  ;;  %v1222_v3 = vpop.permute.xlu0 %1221 }
 0x25c   : > { %v1357_v46 = vrot.slane %v1225_v50, %v2420_v12  ;;  %v1353_v21 = vrot.slane %v1222_v3, %v2417_v10 }
 0x25e   : > { %v1358_v19 = vsel %vm1267_vm6, %v1357_v46, %v1353_v21 }
 0x25f   : > { %v1419_v5 = vsel %vm1406_vm8, %v1358_v19, %v1418_v16  ;;  %v1231_v58 = vpop.permute.xlu1 %1230 }
 0x260   : > { %v1228_v33 = vpop.permute.xlu0 %1227  ;;  %v1366_v20 = vrot.slane %v1231_v58, %v2420_v12 }
 0x261   : > { %v1362_v25 = vrot.slane %v1228_v33, %v2417_v10 }
 0x263   : > { %v1367_v24 = vsel %vm1267_vm6, %v1366_v20, %v1362_v25 }
 0x264   : > { %v1420_v35 = vsel %vm1408_vm9, %v1367_v24, %v1419_v5  ;;  %v1234_v18 = vpop.permute.xlu0 %1233 }
 0x265   : > { %v1371_v49 = vrot.slane %v1234_v18, %v2417_v10 }
 0x267   : > { %v1237_v27 = vpop.permute.xlu1 %1236 }
 0x268   : > { %v1375_v22 = vrot.slane %v1237_v27, %v2420_v12 }
 0x26a   : > { %v1376_v37 = vsel %vm1267_vm6, %v1375_v22, %v1371_v49 }
 0x26b   : > { %v1421_v59 = vsel %vm1410_vm10, %v1376_v37, %v1420_v35  ;;  %v1240_v34 = vpop.permute.xlu0 %1239 }
 0x26c   : > { %v1380_v39 = vrot.slane %v1240_v34, %v2417_v10 }
 0x26f   : > { %v1243_v31 = vpop.permute.xlu1 %1242 }
 0x270   : > { %v1384_v44 = vrot.slane %v1243_v31, %v2420_v12 }
 0x272   : > { %v1385_v32 = vsel %vm1267_vm6, %v1384_v44, %v1380_v39  ;;  %v1246_v62 = vpop.permute.xlu0 %1245 }
 0x273   : > { %v1422_v11 = vsel %vm1412_vm11, %v1385_v32, %v1421_v59  ;;  %v1389_v40 = vrot.slane %v1246_v62, %v2417_v10 }
 0x274   : > { %v1249_v41 = vpop.permute.xlu1 %1248 }
 0x275   : > { %v1393_v47 = vrot.slane %v1249_v41, %v2420_v12 }
 0x277   : > { %v1394_v17 = vsel %vm1267_vm6, %v1393_v47, %v1389_v40 }
 0x278   : > { %v1423_v42 = vsel %vm1414_vm12, %v1394_v17, %v1422_v11  ;;  %v1162_v43 = vpop.permute.xlu1 %1161 }
 0x279   : > { %v1261_v51 = vrot.slane %v1162_v43, %v2417_v10 }
 0x27a   : > { %v1165_v55 = vpop.permute.xlu0 %1164 }
 0x27b   : > { %v1266_v56 = vrot.slane %v1165_v55, %v2420_v12 }
 0x27c   : > { %v1168_v29 = vpop.permute.xlu1 %1167 }
 0x27d   : > { %v1268_v8 = vsel %vm1267_vm6, %v1266_v56, %v1261_v51  ;;  %v1272_v48 = vrot.slane %v1168_v29, %v2417_v10 }
 0x280   : > { %v1171_v57 = vpop.permute.xlu1 %1170 }
 0x281   : > { %v1276_v14 = vrot.slane %v1171_v57, %v2420_v12 }
 0x282   : > { %v1174_v52 = vpop.permute.xlu0 %1173 }
 0x283   : > { %v1277_v4 = vsel %vm1267_vm6, %v1276_v14, %v1272_v48  ;;  %v1281_v45 = vrot.slane %v1174_v52, %v2417_v10 }
 0x284   : > { %v1405_v13 = vsel %vm1404_vm7, %v1277_v4, %v1268_v8 }
 0x286   : > { %v1177_v1 = vpop.permute.xlu1 %1176 }
 0x287   : > { %v1285_v36 = vrot.slane %v1177_v1, %v2420_v12  ;;  %v1180_v38 = vpop.permute.xlu0 %1179 }
 0x288   : > { %v1290_v0 = vrot.slane %v1180_v38, %v2417_v10 }
 0x289   : > { %v1286_v30 = vsel %vm1267_vm6, %v1285_v36, %v1281_v45 }
 0x28a   : > { %v1407_v60 = vsel %vm1406_vm8, %v1286_v30, %v1405_v13  ;;  %v1183_v63 = vpop.permute.xlu1 %1182 }
 0x28b   : > { %v1294_v61 = vrot.slane %v1183_v63, %v2420_v12  ;;  %v1186_v2 = vpop.permute.xlu0 %1185 }
 0x28c   : > { %v1299_v26 = vrot.slane %v1186_v2, %v2417_v10 }
 0x28d   : > { %v1295_v9 = vsel %vm1267_vm6, %v1294_v61, %v1290_v0 }
 0x28e   : > { %v1409_v6 = vsel %vm1408_vm9, %v1295_v9, %v1407_v60  ;;  %v1189_v15 = vpop.permute.xlu1 %1188 }
 0x28f   : > { %v1303_v54 = vrot.slane %v1189_v15, %v2420_v12 }
 0x290   : > { %v1192_v23 = vpop.permute.xlu0 %1191 }
 0x291   : > { %v1304_v28 = vsel %vm1267_vm6, %v1303_v54, %v1299_v26  ;;  %v1308_v7 = vrot.slane %v1192_v23, %v2417_v10 }
 0x292   : > { %v1411_v53 = vsel %vm1410_vm10, %v1304_v28, %v1409_v6  ;;  %v1195_v16 = vpop.permute.xlu1 %1194 }
 0x293   : > { %v1312_v50 = vrot.slane %v1195_v16, %v2420_v12 }
 0x294   : > { %v1198_v3 = vpop.permute.xlu0 %1197 }
 0x295   : > { %v1313_v46 = vsel %vm1267_vm6, %v1312_v50, %v1308_v7  ;;  %v1317_v19 = vrot.slane %v1198_v3, %v2417_v10 }
 0x296   : > { %v1413_v21 = vsel %vm1412_vm11, %v1313_v46, %v1411_v53 }
 0x297   : > { %v1201_v5 = vpop.permute.xlu1 %1200 }
 0x298   : > { %v1321_v58 = vrot.slane %v1201_v5, %v2420_v12 }
 0x299   : > { %v1204_v33 = vpop.permute.xlu0 %1203 }
 0x29a   : > { %v1322_v20 = vsel %vm1267_vm6, %v1321_v58, %v1317_v19  ;;  %v1326_v25 = vrot.slane %v1204_v33, %v2417_v10 }
 0x29b   : > { %v1207_v24 = vpop.permute.xlu1 %1206  ;;  %v1415_v35 = vsel %vm1414_vm12, %v1322_v20, %v1413_v21 }
 0x29c   : > { %v1330_v18 = vrot.slane %v1207_v24, %v2420_v12 }
 0x29d   : > { %v1252_v49 = vpop.permute.xlu0 %1251 }
 0x29e   : > { %v1331_v27 = vsel %vm1267_vm6, %v1330_v18, %v1326_v25  ;;  %v1398_v22 = vrot.slane %v1252_v49, %v2417_v10 }
 0x29f   : > { %v1255_v37 = vpop.permute.xlu1 %1254  ;;  %v1417_v59 = vsel %vm1416_vm13, %v1331_v27, %v1415_v35 }
 0x2a0   : > { %v1402_v34 = vrot.slane %v1255_v37, %v2420_v12  ;;  %1794 = vmatprep.mubr.msk.f32.mxu0 %vm1427_vm14, %v1417_v59  ;;  %v1428_v39 = vsel %vm1427_vm14, %v1417_v59, 0.0 }
 0x2a1   : > { %1429 = vadd.xlane.f32.xlu0 %v1428_v39 }
 0x2a2   : > { %v1403_v31 = vsel %vm1267_vm6, %v1402_v34, %v1398_v22 }
 0x2a3   : > { %v1424_v44 = vsel %vm1416_vm13, %v1403_v31, %v1423_v42 }
 0x2a4   : > { %1795 = vmatmul.mubr.msk.f32.vlgmr.msra.gmra.mrb[2].mxu0 %vm1427_vm14, %v1424_v44  ;;  %v1431_v32 = vsel %vm1427_vm14, %v1424_v44, 0.0 }
 0x2a5   : > { %1432 = vadd.xlane.f32.xlu1 %v1431_v32 }
 0x32e   : > { %v1430_v11 = vpop.xlane.xlu0 %1429 }
 0x32f   : > { %v1434_v41 = vmax.f32 %v1430_v11, 1e-12 }
 0x332   : > { %v1433_v62 = vpop.xlane.xlu1 %1432 }
 0x333   : > { %v1435_v40 = vmax.f32 %v1433_v62, 1e-12 }
 0x335   : > { %2017 = vrcp.f32 %v1435_v40 }
 0x336   : > { %2019 = vrcp.f32 %v1434_v41 }
 0x33f   : > { %v2018_v10 = vpop.eup %2017 }
 0x340   : > { %v2020_v47 = vpop.eup %2019 }
 0x377   : > { %v1796_v12 = vpop.f32.mrb[2].mxu0 }
 0x378   : > { %v1520_v17 = vmul.f32 %v2018_v10, %v1796_v12  ;;  %v1510_v42 = vpop.f32.mrb[3].mxu0 }
 0x379   : > { %v1519_v43 = vmul.f32 %v2020_v47, %v1510_v42 }
 0x37a   : > { %1522 = vst.msk [vmem:[%s234_s21 + $0x8] sm:$0xff] %vm253_vm0, %v1520_v17  ;;  %v1524_v55 = vsel %vm253_vm0, %v1520_v17, 0.0  ;;  %v1535_v51 = vmul.f32 %v1520_v17, %v1520_v17 }
 0x37b   : > { %1521 = vst.msk [vmem:[%s234_s21] sm:$0xff] %vm253_vm0, %v1519_v43  ;;  %v1523_v56 = vsel %vm253_vm0, %v1519_v43, 0.0  ;;  %v1534_v29 = vmul.f32 %v1519_v43, %v1519_v43 }
 0x37c   : > { %v1537_v8 = vsel %vm253_vm0, %v1535_v51, 0.0  ;;  %v1525_v57 = vadd.f32 %v1524_v55, %v1523_v56 }
 0x37d   : > { %2092 = shalt.err (!%p2089_p7)
}
 0x37e   : > { %s2093_s6 = scalar_lea.hbm %s3001_s28, 256  ;;  %s2097_s29 = scalar_lea.hbm %s3125_s2, 512 }
 0x37f   : > { %p2094_p9 = scmp.ne.s32.totalorder %s3001_s28, %s2093_s6  ;;  %p2098_p5 = scmp.lt.u32.totalorder %s3001_s28, %s3125_s2 }
 0x380   : > { %p2099_p11 = scmp.lt.u32.totalorder %s2097_s29, %s2093_s6  ;;  %p2101_p4 = scmp.lt.u32.totalorder %s2093_s6, %s3001_s28 }
 0x381   : > { %p2095_p1 = pnand %p2094_p9, %p2342_p12 }
 0x382   : > { %p2100_p2 = por %p2099_p11, %p2098_p5 }
 0x383   : > { %p2096_p0 = pneg %p2095_p1 }
 0x384   : > { %p2102_p6 = por %p2101_p4, %p2100_p2 }
 0x386   : > { %p2103_p8 = pnand %p2102_p6, %p2096_p0 }
 0x388   : > { %2106 = shalt.err (!%p2103_p8)
}
 0x389   : > { %s2217_s13 = smov 128   ;;  %s2218_s10 = smov 8   ;;  %v1536_v48 = vsel %vm253_vm0, %v1534_v29, 0.0  ;;  %v1526_v14 = vrot.slane %v1525_v57, 4  ;;  %vm1532_vm15 = vcmask 253952  }
 0x38a   : > { %1821 = dma.vmem_to_hbm [thread:$0]  (%p2342_p12), %s2996_s23, 256, %s3001_s28, %s1547_s11, %s2217_s13, %s2217_s13, %s2218_s10   ;;  %v1538_v4 = vadd.f32 %v1537_v8, %v1536_v48 }
 0x38b   : > { %v1527_v52 = vadd.f32 %v1526_v14, %v1525_v57  ;;  %s1551_s9 = sand.u32 1, %s2267_s19   ;;  %s1752_s26 = sshll.u32 %s2267_s19, 4 }
 0x38c   : > { %v1539_v13 = vrot.slane %v1538_v4, 4  ;;  %s240_s25 = scalar_lea.vmem [#allocation8], %s2393_s14  ;;  %s246_s23 = scalar_lea.vmem [#allocation10], %s2393_s14 }
 0x38d   : > { %v1528_v1 = vrot.slane %v1527_v52, 2  ;;  %s1584_s24 = sshll.u32 %s240_s25, 4  ;;  %s1597_s28 = sshll.u32 %s246_s23, 4  ;;  %s3044_s24 = int_to_ptr.vmem [resolvable:$true] %s1584_s24  ;;  %s3052_s28 = int_to_ptr.vmem [resolvable:$true] %s1597_s28 }
 0x38e   : > { %v1540_v45 = vadd.f32 %v1539_v13, %v1538_v4  ;;  %s3042_s7 = scalar_lea.hbm %s3126_s3, %s1752_s26  ;;  %s3050_s29 = scalar_lea.hbm %s3127_s4, %s1752_s26 }
 0x38f   : > { %v1529_v36 = vadd.f32 %v1528_v1, %v1527_v52  ;;  %s3054_s21 = scalar_lea.sflag [#allocation9], %s1551_s9  ;;  %s2107_s12 = scalar_lea.vmem %s3044_s24, 16 }
 0x390   : > { %v1541_v38 = vrot.slane %v1540_v45, 2  ;;  %p2108_p10 = scmp.ne.s32.totalorder %s3044_s24, %s2107_s12  ;;  %s2219_s13 = smov [#allocation8]  }
 0x391   : > { %v1530_v30 = vrot.slane %v1529_v36, 1  ;;  %s2111_s10 = sshll.u32 %s2219_s13, 4  ;;  %s2112_s10 = int_to_ptr.vmem [resolvable:$false] %s2111_s10 }
 0x392   : > { %v1542_v0 = vadd.f32 %v1541_v38, %v1540_v45  ;;  %p2109_p13 = pnand %p2108_p10, %p2342_p12  ;;  %s2113_s11 = scalar_lea.vmem %s2112_s10, 32 }
 0x393   : > { %v1531_v60 = vadd.f32 %v1530_v30, %v1529_v36  ;;  %p2114_p7 = scmp.lt.s32.totalorder %s3044_s24, %s2112_s10  ;;  %p2115_p9 = scmp.lt.s32.totalorder %s2113_s11, %s2107_s12 }
 0x394   : > { %v1543_v63 = vrot.slane %v1542_v0, 1  ;;  %p2110_p3 = pneg %p2109_p13 }
 0x395   : > { %1533 = vst.msk [vmem:[%s240_s25] sm:$0x1] %vm1532_vm15, %v1531_v60  ;;  %p2116_p1 = por %p2115_p9, %p2114_p7 }
 0x396   : > { %v1544_v61 = vadd.f32 %v1543_v63, %v1542_v0 }
 0x397   : > { %p2117_p0 = pnand %p2116_p1, %p2110_p3 }
 0x399   : > { %2120 = shalt.err (!%p2117_p0)
}
 0x39a   : > { %s2121_s9 = scalar_lea.hbm %s3042_s7, 16  ;;  %s2125_s6 = scalar_lea.hbm %s3126_s3, 32 }
 0x39b   : > { %p2122_p5 = scmp.ne.s32.totalorder %s3042_s7, %s2121_s9  ;;  %p2126_p4 = scmp.lt.u32.totalorder %s3042_s7, %s3126_s3 }
 0x39c   : > { %p2127_p6 = scmp.lt.u32.totalorder %s2125_s6, %s2121_s9  ;;  %p2129_p10 = scmp.lt.u32.totalorder %s2121_s9, %s3042_s7 }
 0x39d   : > { %p2123_p11 = pnand %p2122_p5, %p2342_p12 }
 0x39e   : > { %p2128_p8 = por %p2127_p6, %p2126_p4 }
 0x39f   : > { %p2124_p2 = pneg %p2123_p11 }
 0x3a0   : > { %p2130_p13 = por %p2129_p10, %p2128_p8 }
 0x3a2   : > { %p2131_p3 = pnand %p2130_p13, %p2124_p2 }
 0x3a4   : > { %2134 = shalt.err (!%p2131_p3)
}
 0x3a5   : > { %1822 = dma.vmem_to_hbm [thread:$0]  (%p2342_p12), %s3044_s24, 16, %s3042_s7, %s3054_s21   ;;  %1545 = vst.msk [vmem:[%s246_s23] sm:$0x1] %vm1532_vm15, %v1544_v61 }
 0x3a6   : > { %s2135_s12 = scalar_lea.vmem %s3052_s28, 16  ;;  %s2220_s13 = smov [#allocation10]  }
 0x3a7   : > { %p2136_p7 = scmp.ne.s32.totalorder %s3052_s28, %s2135_s12  ;;  %s2139_s10 = sshll.u32 %s2220_s13, 4  ;;  %s2140_s10 = int_to_ptr.vmem [resolvable:$false] %s2139_s10 }
 0x3a8   : > { %s2141_s11 = scalar_lea.vmem %s2140_s10, 32  ;;  %p2142_p0 = scmp.lt.s32.totalorder %s3052_s28, %s2140_s10 }
 0x3a9   : > { %p2137_p9 = pnand %p2136_p7, %p2342_p12  ;;  %p2143_p5 = scmp.lt.s32.totalorder %s2141_s11, %s2135_s12 }
 0x3ab   : > { %p2138_p1 = pneg %p2137_p9  ;;  %p2144_p11 = por %p2143_p5, %p2142_p0 }
 0x3ad   : > { %p2145_p2 = pnand %p2144_p11, %p2138_p1 }
 0x3af   : > { %2148 = shalt.err (!%p2145_p2)
}
 0x3b0   : > { %s2149_s14 = scalar_lea.hbm %s3050_s29, 16  ;;  %s2153_s7 = scalar_lea.hbm %s3127_s4, 32 }
 0x3b1   : > { %p2150_p4 = scmp.ne.s32.totalorder %s3050_s29, %s2149_s14  ;;  %p2154_p10 = scmp.lt.u32.totalorder %s3050_s29, %s3127_s4 }
 0x3b2   : > { %p2155_p13 = scmp.lt.u32.totalorder %s2153_s7, %s2149_s14  ;;  %p2157_p7 = scmp.lt.u32.totalorder %s2149_s14, %s3050_s29 }
 0x3b3   : > { %p2151_p6 = pnand %p2150_p4, %p2342_p12 }
 0x3b4   : > { %p2156_p3 = por %p2155_p13, %p2154_p10 }
 0x3b5   : > { %p2152_p8 = pneg %p2151_p6 }
 0x3b6   : > { %p2158_p9 = por %p2157_p7, %p2156_p3 }
 0x3b8   : > { %p2159_p1 = pnand %p2158_p9, %p2152_p8 }
 0x3ba   : > { %2162 = shalt.err (!%p2159_p1)
}
 0x3bb   : > { %1823 = dma.vmem_to_hbm [thread:$0]  (%p2342_p12), %s3052_s28, 16, %s3050_s29, %s3054_s21  }
 0x3bc PF: > { %s1609_s25 = sand.u32 1, %s2197_s15   ;;  %p3142_p0 = scmp.ne.s32.totalorder %s3132_s22, 0 }
 0x3bd   : > { %p3143_p5 = scmp.ge.s32.totalorder %s2209_s18, 2  ;;  %s1610_s6 = scalar_lea.sflag [#allocation4], %s1609_s25 }
 0x3bf   : > { %p1836_p11 = pnand %p3143_p5, %p3142_p0 }
 0x3c1   : > { %2188 = dma.done.wait (!%p1836_p11), %s1610_s6, 256  }
 0x3c2   : > { %2190 = vsyncadd (!%p1836_p11), %s1610_s6, 4294967040  ;;  %s1618_s19 = sand.u32 1, %s1730_s20  }
 0x3c3   : > { %s1619_s8 = scalar_lea.sflag [#allocation9], %s1618_s19 }
 0x3c4   : > { %2192 = dma.done.wait (!%p1836_p11), %s1619_s8, 32  }
 0x3c5   : > { %2194 = vsyncadd (!%p1836_p11), %s1619_s8, 4294967264  ;;  %p22_p12 = scmp.ge.s32.totalorder %s2304_s27, 4   ;;  %s3144_s15 = smov %s2201_s16 }
 0x3c6   : > { %s3145_s16 = smov %s2205_s17  ;;  %s3146_s17 = smov %s2338_s30 }
 0x3c7   : > { %s3147_s18 = smov %s2304_s27  ;;  %24 = sbr.rel (!%p22_p12) target bundleno = 8 (0x8), region = 109 }
 0x3ce   :  { %1631 = vsyncpa [#allocation3], 1 }
 0x3cf   :  { %1633 = vsyncpa [#allocation3 + $0x1], 1 }
 0x3d0   :  { %1634 = vsyncpa [#allocation6], 1 }
 0x3d1   :  { %1635 = vsyncpa [#allocation4], 1 }
 0x3d2   :  { %1637 = vsyncpa [#allocation4 + $0x1], 1 }
 0x3d3   :  { %1638 = vsyncpa [#allocation9], 1 }
 0x3d4   :  { %1640 = vsyncpa [#allocation9 + $0x1], 1 }

</bundles_post_ra>
